<compile_context>
chip_gen: v7x
topology: tpu7x:2x2x1
jax: 0.10.0
libtpu: 0.0.40
codegen_flags: <defaults>
</compile_context>

<pallas_src>
import functools

import jax
import jax.numpy as jnp
from jax.experimental import pallas as pl
from jax.experimental.pallas import tpu as pltpu

KERNEL_SIZE = 3              # TimeBlock default kernel_size
BN_EPS = 1e-5
MATMUL_DTYPE = jnp.bfloat16  # MXU input precision (accumulation stays f32)


def _mxu(a):
    return a.astype(MATMUL_DTYPE)


def _full_spec(arr):
    nd = arr.ndim
    return pl.BlockSpec(arr.shape, lambda *_: (0,) * nd)


# ---------------------------------------------------------------------------
# TimeBlock body on a per-batch row-major slab (rows = (node, time)).
#   get_tap(k) -> (n_rows, C_in) bf16  : k-th shifted tap window
#   mask       -> (n_rows, 1)  f32     : 1.0 on valid rows (time < T_out)
#   returns (n_rows, C_out) f32.
# ---------------------------------------------------------------------------
def _timeblock_body(get_tap, mask, wcat_ref, bcat_ref,
                    fc1w_ref, fc1b_ref, fc2w_ref, fc2b_ref,
                    *, n_rows, c_out, inv_pool):
    acc = jnp.zeros((n_rows, 3 * c_out), jnp.float32)
    for k in range(KERNEL_SIZE):                       # K shifted tap windows
        acc = acc + jnp.dot(get_tap(k), wcat_ref[k],
                            preferred_element_type=jnp.float32)
    y = acc + bcat_ref[...]                            # (n_rows, 3*C_out)
    c1 = y[:, :c_out]
    c2 = y[:, c_out:2 * c_out]
    c3 = y[:, 2 * c_out:]
    out = jnp.maximum(c1 + jax.nn.sigmoid(c2) + c3, 0.0)   # (n_rows, C_out)

    # ChannelAttention: masked global average pool over valid (node,time) rows.
    pooled = jnp.sum(out * mask, axis=0, keepdims=True) * inv_pool
    h = jnp.maximum(
        jnp.dot(_mxu(pooled), _mxu(fc1w_ref[...]),
                preferred_element_type=jnp.float32) + fc1b_ref[...], 0.0)
    scale = jax.nn.sigmoid(
        jnp.dot(_mxu(h), _mxu(fc2w_ref[...]),
                preferred_element_type=jnp.float32) + fc2b_ref[...])  # (1,C_out)
    return out * scale
    # TODO(synk): TimeBlock declares nn.Dropout(0.5) but never applies it in
    # forward(), so dropout is intentionally absent here.


# ---------------------------------------------------------------------------
# Fused per-batch kernel:
#   TimeBlock1 -> @Theta1 -> relu((A_hat (x) I_T) @ u) -> TimeBlock2
#   -> per-node gather of valid (time < T2) rows into node-major output.
# ---------------------------------------------------------------------------
def _stgcn_fused_kernel(x_ref, mask1_ref, mask2_ref, akron_ref,
                        wcat1_ref, bcat1_ref, fc1w1_ref, fc1b1_ref,
                        fc2w1_ref, fc2b1_ref, theta_ref,
                        wcat2_ref, bcat2_ref, fc1w2_ref, fc1b2_ref,
                        fc2w2_ref, fc2b2_ref, o_ref,
                        *, n_nodes, t_in, t1, t2, c_out):
    K = KERNEL_SIZE
    n_rows = n_nodes * t_in - (K - 1)

    # --- TimeBlock 1: X read from VMEM once, K shifted slices ----------------
    t_rows = _timeblock_body(lambda k: _mxu(x_ref[k:k + n_rows, :]),
                             mask1_ref[...], wcat1_ref, bcat1_ref,
                             fc1w1_ref, fc1b1_ref, fc2w1_ref, fc2b1_ref,
                             n_rows=n_rows, c_out=c_out,
                             inv_pool=1.0 / float(n_nodes * t1))

    # --- fused @ Theta1 (relu(A@(t@Th)) == relu((A@t)@Th)) -------------------
    u = jnp.dot(_mxu(t_rows), theta_ref[...],
                preferred_element_type=jnp.float32)            # (n_rows, S)

    # --- graph conv on the same row slab via A_hat (x) I_T (no relayout) -----
    t2_slab = jnp.maximum(
        jnp.dot(akron_ref[...], _mxu(u), preferred_element_type=jnp.float32),
        0.0)                                                   # (N*T, S)
    t2b = _mxu(t2_slab)

    # --- TimeBlock 2 on the same slab ----------------------------------------
    t3_rows = _timeblock_body(lambda k: t2b[k:k + n_rows, :],
                              mask2_ref[...], wcat2_ref, bcat2_ref,
                              fc1w2_ref, fc1b2_ref, fc2w2_ref, fc2b2_ref,
                              n_rows=n_rows, c_out=c_out,
                              inv_pool=1.0 / float(n_nodes * t2))

    # --- gather valid rows per node (static slices) into node-major output ---
    for n in range(n_nodes):
        o_ref[n] = t3_rows[n * t_in:n * t_in + t2, :].astype(o_ref.dtype)


def stgcn_fused_pallas(x_rows, mask1, mask2, a_kron,
                       wcat1, bcat1, fc1w1, fc1b1, fc2w1, fc2b1, theta,
                       wcat2, bcat2, fc1w2, fc1b2, fc2w2, fc2b2,
                       *, n_nodes, t_in, t1, t2, c_out):
    """x_rows: (B, N*T, C_in) -> (N, B, T2, C_out) node-major output."""
    B, R, c_in = x_rows.shape
    kern = functools.partial(_stgcn_fused_kernel, n_nodes=n_nodes, t_in=t_in,
                             t1=t1, t2=t2, c_out=c_out)
    full = [mask1, mask2, a_kron,
            wcat1, bcat1, fc1w1, fc1b1, fc2w1, fc2b1, theta,
            wcat2, bcat2, fc1w2, fc1b2, fc2w2, fc2b2]
    return pl.pallas_call(
        kern,
        out_shape=jax.ShapeDtypeStruct((n_nodes, B, t2, c_out), jnp.float32),
        grid_spec=pltpu.PrefetchScalarGridSpec(
            num_scalar_prefetch=0,
            grid=(B,),
            in_specs=[pl.BlockSpec((None, R, c_in), lambda b: (b, 0, 0))]
                     + [_full_spec(a) for a in full],
            out_specs=pl.BlockSpec((n_nodes, None, t2, c_out),
                                   lambda b: (0, b, 0, 0))),
        compiler_params=pltpu.CompilerParams(
            dimension_semantics=("parallel",)),
    )(x_rows, *full)


# ---------------------------------------------------------------------------
# BatchNorm2d(num_nodes), training-mode batch statistics.  One program:
# nodes on sublanes, B*T2*C flattened onto the lane axis (lane-dense).
# Writes (B, N, T2*C) directly so no HBM transpose is needed afterwards.
# ---------------------------------------------------------------------------
def _bn_kernel(x_ref, g_ref, b_ref, o_ref, *, n_batch, chunk):
    x = x_ref[...]                                      # (N, B*T2*C)
    mean = jnp.mean(x, axis=1, keepdims=True)
    d = x - mean
    var = jnp.mean(d * d, axis=1, keepdims=True)        # biased (training mode)
    inv = jax.lax.rsqrt(var + BN_EPS)
    y = d * inv * g_ref[...] + b_ref[...]
    for b in range(n_batch):                            # aligned lane slices
        o_ref[b] = y[:, b * chunk:(b + 1) * chunk].astype(o_ref.dtype)


def bn_pallas(x_flat, gamma_col, beta_col, *, n_batch):
    n_nodes, total = x_flat.shape
    chunk = total // n_batch
    return pl.pallas_call(
        functools.partial(_bn_kernel, n_batch=n_batch, chunk=chunk),
        out_shape=jax.ShapeDtypeStruct((n_batch, n_nodes, chunk), x_flat.dtype),
    )(x_flat, gamma_col, beta_col)


# ---------------------------------------------------------------------------
# STGCNBlock forward (wrapper glue is only free reshapes + tiny constant prep).
# ---------------------------------------------------------------------------
@jax.jit
def stgcn_block_forward(X, A_hat, p):
    B, N, T, c_in = X.shape
    K = KERNEL_SIZE
    T1 = T - (K - 1)
    T2 = T1 - (K - 1)
    L1 = N * T - (K - 1)

    w1, b1, w2, b2, w3, b3, fc1w1, fc1b1, fc2w1, fc2b1 = p['tb1']
    v1, d1, v2, d2, v3, d3, fc1w2, fc1b2, fc2w2, fc2b2 = p['tb2']
    c_out = w1.shape[-1]

    wcat1 = _mxu(jnp.concatenate([w1, w2, w3], axis=-1))    # (K, Cin, 3*Cout)
    bcat1 = jnp.concatenate([b1, b2, b3], axis=-1)          # (1, 3*Cout)
    wcat2 = _mxu(jnp.concatenate([v1, v2, v3], axis=-1))    # (K, S, 3*Cout)
    bcat2 = jnp.concatenate([d1, d2, d3], axis=-1)
    theta_b = _mxu(p['theta'])

    # A_hat (x) I_T applied on the (node,time) row slab; columns for the last
    # K-1 (garbage-time) rows are dropped so the slab input is exactly L1 rows.
    eye_t = jnp.eye(T, dtype=jnp.float32)
    a_kron = _mxu((A_hat[:, None, :, None] * eye_t[None, :, None, :])
                  .reshape(N * T, N * T)[:, :L1])            # (N*T, L1) bf16

    mask1 = ((jnp.arange(L1) % T) < T1).astype(jnp.float32)[:, None]
    mask2 = ((jnp.arange(L1) % T) < T2).astype(jnp.float32)[:, None]

    x_rows = X.reshape(B, N * T, c_in)

    t3_nb = stgcn_fused_pallas(
        x_rows, mask1, mask2, a_kron,
        wcat1, bcat1, fc1w1, fc1b1, fc2w1, fc2b1, theta_b,
        wcat2, bcat2, fc1w2, fc1b2, fc2w2, fc2b2,
        n_nodes=N, t_in=T, t1=T1, t2=T2, c_out=c_out)        # (N, B, T2, Cout)

    x_bn = t3_nb.reshape(N, B * T2 * c_out)                  # free reshape
    y = bn_pallas(x_bn, p['gamma'][:, None], p['beta'][:, None], n_batch=B)
    return y.reshape(B, N, T2, c_out)                        # free reshape


# ---------------------------------------------------------------------------
# Pure-JAX reference.  Mirrors the kernel's precision policy (bf16 matmul
# inputs, f32 accumulation) and the Theta-first associativity; with
# MATMUL_DTYPE = float32 it is exactly the PyTorch f32 computation.
# ---------------------------------------------------------------------------
def _timeblock_ref(x, w1, b1, w2, b2, w3, b3, fc1w, fc1b, fc2w, fc2b):
    K = w1.shape[0]
    T_out = x.shape[2] - K + 1

    def conv(w, b):
        acc = 0.0
        for k in range(K):
            acc = acc + jnp.einsum(
                'bntc,cd->bntd',
                x[:, :, k:k + T_out, :].astype(MATMUL_DTYPE),
                w[k].astype(MATMUL_DTYPE),
                preferred_element_type=jnp.float32)
        return acc + b[0]

    c1, c2, c3 = conv(w1, b1), conv(w2, b2), conv(w3, b3)
    out = jax.nn.relu(c1 + jax.nn.sigmoid(c2) + c3)
    pooled = out.mean(axis=(1, 2))                              # (B, Cout)
    h = jax.nn.relu(
        jnp.dot(pooled.astype(MATMUL_DTYPE), fc1w.astype(MATMUL_DTYPE),
                preferred_element_type=jnp.float32) + fc1b[0])
    scale = jax.nn.sigmoid(
        jnp.dot(h.astype(MATMUL_DTYPE), fc2w.astype(MATMUL_DTYPE),
                preferred_element_type=jnp.float32) + fc2b[0])
    return out * scale[:, None, None, :]


def stgcn_block_ref(X, A_hat, p):
    t = _timeblock_ref(X, *p['tb1'])
    u = jnp.einsum('bntc,cs->bnts', t.astype(MATMUL_DTYPE),
                   p['theta'].astype(MATMUL_DTYPE),
                   preferred_element_type=jnp.float32)
    t2 = jax.nn.relu(jnp.einsum('ij,bjts->bits', A_hat.astype(MATMUL_DTYPE),
                                u.astype(MATMUL_DTYPE),
                                preferred_element_type=jnp.float32))
    t3 = _timeblock_ref(t2, *p['tb2'])
    mean = t3.mean(axis=(0, 2, 3), keepdims=True)
    var = ((t3 - mean) ** 2).mean(axis=(0, 2, 3), keepdims=True)
    g = p['gamma'][None, :, None, None]
    b = p['beta'][None, :, None, None]
    return (t3 - mean) * jax.lax.rsqrt(var + BN_EPS) * g + b


# ---------------------------------------------------------------------------
# Deterministic parameter init (shapes from the module's __init__).
# ---------------------------------------------------------------------------
def init_params(key, in_channels, spatial_channels, out_channels, num_nodes,
                K=KERNEL_SIZE, reduction_ratio=16):
    hidden = max(out_channels // reduction_ratio, 1)
    keys = iter(jax.random.split(key, 64))

    def u(shape, bound):
        return jax.random.uniform(next(keys), shape, jnp.float32, -bound, bound)

    def timeblock_params(cin):
        cb = 1.0 / (cin * K) ** 0.5
        l1 = 1.0 / out_channels ** 0.5
        l2 = 1.0 / hidden ** 0.5
        return (u((K, cin, out_channels), cb), u((1, out_channels), cb),   # conv1
                u((K, cin, out_channels), cb), u((1, out_channels), cb),   # conv2
                u((K, cin, out_channels), cb), u((1, out_channels), cb),   # conv3
                u((out_channels, hidden), l1), u((1, hidden), l1),         # fc1 (W^T)
                u((hidden, out_channels), l2), u((1, out_channels), l2))   # fc2 (W^T)

    stdv = 1.0 / spatial_channels ** 0.5
    return {
        'tb1': timeblock_params(in_channels),
        'theta': u((out_channels, spatial_channels), stdv),
        'tb2': timeblock_params(spatial_channels),
        'gamma': jnp.ones((num_nodes,), jnp.float32),   # BatchNorm2d defaults
        'beta': jnp.zeros((num_nodes,), jnp.float32),
    }


if __name__ == "__main__":
    B, N, T = 2, 8, 12
    in_channels, spatial_channels, out_channels = 4, 16, 32

    key = jax.random.PRNGKey(0)
    kx, ka, kp = jax.random.split(key, 3)
    X = jax.random.normal(kx, (B, N, T, in_channels), jnp.float32)
    A = jax.random.uniform(ka, (N, N), jnp.float32)
    A_hat = A / A.sum(axis=1, keepdims=True)            # row-normalized adjacency
    params = init_params(kp, in_channels, spatial_channels, out_channels, N)

    out = jax.block_until_ready(stgcn_block_forward(X, A_hat, params))
    ref = jax.block_until_ready(stgcn_block_ref(X, A_hat, params))

    assert out.shape == (B, N, T - 4, out_channels), out.shape
    assert bool(jnp.allclose(out, ref, atol=5e-3, rtol=5e-3)), \
        float(jnp.max(jnp.abs(out - ref)))
    print("KERNEL_OK")
</pallas_src>

<mosaic_0001>
module attributes {stable_mosaic.version = 11 : i64} {
  func.func @_bn_kernel(%arg0: memref<8x512xf32, #tpu.memory_space<vmem>>, %arg1: memref<8x1xf32, #tpu.memory_space<vmem>>, %arg2: memref<8x1xf32, #tpu.memory_space<vmem>>, %arg3: memref<2x8x256xf32, #tpu.memory_space<vmem>>) attributes {dimension_semantics = [], scalar_prefetch = 0 : i64, scratch_operands = 0 : i64, tpu.core_type = #tpu.core_type<tc>} {
    %c0 = arith.constant 0 : index
    %c0_0 = arith.constant 0 : index
    %0 = vector.load %arg0[%c0, %c0_0] : memref<8x512xf32, #tpu.memory_space<vmem>>, vector<8x512xf32>
    %cst = arith.constant dense<0.000000e+00> : vector<8xf32>
    %1 = vector.multi_reduction <add>, %0, %cst [1] : vector<8x512xf32> to vector<8xf32>
    %2 = vector.shape_cast %1 : vector<8xf32> to vector<8x1xf32>
    %cst_1 = arith.constant 5.120000e+02 : f32
    %3 = vector.broadcast %cst_1 : f32 to vector<8x1xf32>
    %4 = arith.divf %2, %3 : vector<8x1xf32>
    %5 = vector.broadcast %4 : vector<8x1xf32> to vector<8x512xf32>
    %6 = arith.subf %0, %5 : vector<8x512xf32>
    %7 = arith.mulf %6, %6 : vector<8x512xf32>
    %cst_2 = arith.constant dense<0.000000e+00> : vector<8xf32>
    %8 = vector.multi_reduction <add>, %7, %cst_2 [1] : vector<8x512xf32> to vector<8xf32>
    %9 = vector.shape_cast %8 : vector<8xf32> to vector<8x1xf32>
    %cst_3 = arith.constant 5.120000e+02 : f32
    %10 = vector.broadcast %cst_3 : f32 to vector<8x1xf32>
    %11 = arith.divf %9, %10 : vector<8x1xf32>
    %cst_4 = arith.constant 9.99999974E-6 : f32
    %12 = vector.broadcast %cst_4 : f32 to vector<8x1xf32>
    %13 = arith.addf %11, %12 : vector<8x1xf32>
    %14 = math.rsqrt %13 : vector<8x1xf32>
    %15 = vector.broadcast %14 : vector<8x1xf32> to vector<8x512xf32>
    %16 = arith.mulf %6, %15 : vector<8x512xf32>
    %c0_5 = arith.constant 0 : index
    %c0_6 = arith.constant 0 : index
    %17 = vector.load %arg1[%c0_5, %c0_6] : memref<8x1xf32, #tpu.memory_space<vmem>>, vector<8x1xf32>
    %18 = vector.broadcast %17 : vector<8x1xf32> to vector<8x512xf32>
    %19 = arith.mulf %16, %18 : vector<8x512xf32>
    %c0_7 = arith.constant 0 : index
    %c0_8 = arith.constant 0 : index
    %20 = vector.load %arg2[%c0_7, %c0_8] : memref<8x1xf32, #tpu.memory_space<vmem>>, vector<8x1xf32>
    %21 = vector.broadcast %20 : vector<8x1xf32> to vector<8x512xf32>
    %22 = arith.addf %19, %21 : vector<8x512xf32>
    %23 = vector.extract_strided_slice %22 {offsets = [0, 0], sizes = [8, 256], strides = [1, 1]} : vector<8x512xf32> to vector<8x256xf32>
    %c0_9 = arith.constant 0 : index
    %c0_10 = arith.constant 0 : index
    %c0_11 = arith.constant 0 : index
    %24 = vector.load %arg3[%c0_9, %c0_10, %c0_11] : memref<2x8x256xf32, #tpu.memory_space<vmem>>, vector<1x8x256xf32>
    %25 = vector.shape_cast %24 : vector<1x8x256xf32> to vector<8x256xf32>
    %26 = vector.shape_cast %23 : vector<8x256xf32> to vector<1x8x256xf32>
    tpu.vector_store %arg3[%c0_9, %c0_10, %c0_11], %26 {strides = array<i32>} : memref<2x8x256xf32, #tpu.memory_space<vmem>>, vector<1x8x256xf32>,
    %27 = vector.extract_strided_slice %22 {offsets = [0, 256], sizes = [8, 256], strides = [1, 1]} : vector<8x512xf32> to vector<8x256xf32>
    %c1 = arith.constant 1 : index
    %c0_12 = arith.constant 0 : index
    %c0_13 = arith.constant 0 : index
    %28 = vector.load %arg3[%c1, %c0_12, %c0_13] : memref<2x8x256xf32, #tpu.memory_space<vmem>>, vector<1x8x256xf32>
    %29 = vector.shape_cast %28 : vector<1x8x256xf32> to vector<8x256xf32>
    %30 = vector.shape_cast %27 : vector<8x256xf32> to vector<1x8x256xf32>
    tpu.vector_store %arg3[%c1, %c0_12, %c0_13], %30 {strides = array<i32>} : memref<2x8x256xf32, #tpu.memory_space<vmem>>, vector<1x8x256xf32>,
    return
  }
}

module attributes {stable_mosaic.version = 11 : i64} {
  func.func @_stgcn_fused_kernel(%arg0: i32, %arg1: memref<1x96x4xf32, #tpu.memory_space<vmem>>, %arg2: memref<94x1xf32, #tpu.memory_space<vmem>>, %arg3: memref<94x1xf32, #tpu.memory_space<vmem>>, %arg4: memref<96x94xbf16, #tpu.memory_space<vmem>>, %arg5: memref<3x4x96xbf16, #tpu.memory_space<vmem>>, %arg6: memref<1x96xf32, #tpu.memory_space<vmem>>, %arg7: memref<32x2xf32, #tpu.memory_space<vmem>>, %arg8: memref<1x2xf32, #tpu.memory_space<vmem>>, %arg9: memref<2x32xf32, #tpu.memory_space<vmem>>, %arg10: memref<1x32xf32, #tpu.memory_space<vmem>>, %arg11: memref<32x16xbf16, #tpu.memory_space<vmem>>, %arg12: memref<3x16x96xbf16, #tpu.memory_space<vmem>>, %arg13: memref<1x96xf32, #tpu.memory_space<vmem>>, %arg14: memref<32x2xf32, #tpu.memory_space<vmem>>, %arg15: memref<1x2xf32, #tpu.memory_space<vmem>>, %arg16: memref<2x32xf32, #tpu.memory_space<vmem>>, %arg17: memref<1x32xf32, #tpu.memory_space<vmem>>, %arg18: memref<8x1x8x32xf32, #tpu.memory_space<vmem>>) attributes {dimension_semantics = [#tpu.dimension_semantics<parallel>], iteration_bounds = array<i64: 2>, scalar_prefetch = 0 : i64, scratch_operands = 0 : i64, tpu.core_type = #tpu.core_type<tc>, window_params = [{transform_indices = @transform_0, window_bounds = array<i64: 1, 96, 4>}, {pipeline_mode = #tpu.pipeline_mode<synchronous>, transform_indices = @transform_1, window_bounds = array<i64: 94, 1>}, {pipeline_mode = #tpu.pipeline_mode<synchronous>, transform_indices = @transform_2, window_bounds = array<i64: 94, 1>}, {pipeline_mode = #tpu.pipeline_mode<synchronous>, transform_indices = @transform_3, window_bounds = array<i64: 96, 94>}, {pipeline_mode = #tpu.pipeline_mode<synchronous>, transform_indices = @transform_4, window_bounds = array<i64: 3, 4, 96>}, {pipeline_mode = #tpu.pipeline_mode<synchronous>, transform_indices = @transform_5, window_bounds = array<i64: 1, 96>}, {pipeline_mode = #tpu.pipeline_mode<synchronous>, transform_indices = @transform_6, window_bounds = array<i64: 32, 2>}, {pipeline_mode = #tpu.pipeline_mode<synchronous>, transform_indices = @transform_7, window_bounds = array<i64: 1, 2>}, {pipeline_mode = #tpu.pipeline_mode<synchronous>, transform_indices = @transform_8, window_bounds = array<i64: 2, 32>}, {pipeline_mode = #tpu.pipeline_mode<synchronous>, transform_indices = @transform_9, window_bounds = array<i64: 1, 32>}, {pipeline_mode = #tpu.pipeline_mode<synchronous>, transform_indices = @transform_10, window_bounds = array<i64: 32, 16>}, {pipeline_mode = #tpu.pipeline_mode<synchronous>, transform_indices = @transform_11, window_bounds = array<i64: 3, 16, 96>}, {pipeline_mode = #tpu.pipeline_mode<synchronous>, transform_indices = @transform_12, window_bounds = array<i64: 1, 96>}, {pipeline_mode = #tpu.pipeline_mode<synchronous>, transform_indices = @transform_13, window_bounds = array<i64: 32, 2>}, {pipeline_mode = #tpu.pipeline_mode<synchronous>, transform_indices = @transform_14, window_bounds = array<i64: 1, 2>}, {pipeline_mode = #tpu.pipeline_mode<synchronous>, transform_indices = @transform_15, window_bounds = array<i64: 2, 32>}, {pipeline_mode = #tpu.pipeline_mode<synchronous>, transform_indices = @transform_16, window_bounds = array<i64: 1, 32>}, {transform_indices = @transform_17, window_bounds = array<i64: 8, 1, 8, 32>}]} {
    %c0 = arith.constant 0 : index
    %c0_0 = arith.constant 0 : index
    %0 = vector.load %arg2[%c0, %c0_0] : memref<94x1xf32, #tpu.memory_space<vmem>>, vector<94x1xf32>
    %cst = arith.constant 0.000000e+00 : f32
    %1 = vector.broadcast %cst : f32 to vector<94x96xf32>
    %c0_1 = arith.constant 0 : index
    %c0_2 = arith.constant 0 : index
    %c0_3 = arith.constant 0 : index
    %2 = vector.load %arg1[%c0_1, %c0_2, %c0_3] : memref<1x96x4xf32, #tpu.memory_space<vmem>>, vector<1x94x4xf32>
    %3 = vector.shape_cast %2 : vector<1x94x4xf32> to vector<94x4xf32>
    %4 = arith.truncf %3 : vector<94x4xf32> to vector<94x4xbf16>
    %c0_4 = arith.constant 0 : index
    %c0_5 = arith.constant 0 : index
    %c0_6 = arith.constant 0 : index
    %5 = vector.load %arg5[%c0_4, %c0_5, %c0_6] : memref<3x4x96xbf16, #tpu.memory_space<vmem>>, vector<1x4x96xbf16>
    %6 = vector.shape_cast %5 : vector<1x4x96xbf16> to vector<4x96xbf16>
    %cst_7 = arith.constant dense<0.000000e+00> : vector<94x96xf32>
    %7 = tpu.matmul %4, %6, %cst_7 {dimension_numbers = #tpu.dot_dimension_numbers<[1], [0], [0], [1], [0, 0, 1, 1], [], []>} : vector<94x4xbf16>, vector<4x96xbf16>, vector<94x96xf32> -> vector<94x96xf32>
    %8 = arith.addf %1, %7 : vector<94x96xf32>
    %c0_8 = arith.constant 0 : index
    %c1 = arith.constant 1 : index
    %c0_9 = arith.constant 0 : index
    %9 = vector.load %arg1[%c0_8, %c1, %c0_9] : memref<1x96x4xf32, #tpu.memory_space<vmem>>, vector<1x94x4xf32>
    %10 = vector.shape_cast %9 : vector<1x94x4xf32> to vector<94x4xf32>
    %11 = arith.truncf %10 : vector<94x4xf32> to vector<94x4xbf16>
    %c1_10 = arith.constant 1 : index
    %c0_11 = arith.constant 0 : index
    %c0_12 = arith.constant 0 : index
    %12 = vector.load %arg5[%c1_10, %c0_11, %c0_12] : memref<3x4x96xbf16, #tpu.memory_space<vmem>>, vector<1x4x96xbf16>
    %13 = vector.shape_cast %12 : vector<1x4x96xbf16> to vector<4x96xbf16>
    %cst_13 = arith.constant dense<0.000000e+00> : vector<94x96xf32>
    %14 = tpu.matmul %11, %13, %cst_13 {dimension_numbers = #tpu.dot_dimension_numbers<[1], [0], [0], [1], [0, 0, 1, 1], [], []>} : vector<94x4xbf16>, vector<4x96xbf16>, vector<94x96xf32> -> vector<94x96xf32>
    %15 = arith.addf %8, %14 : vector<94x96xf32>
    %c0_14 = arith.constant 0 : index
    %c2 = arith.constant 2 : index
    %c0_15 = arith.constant 0 : index
    %16 = vector.load %arg1[%c0_14, %c2, %c0_15] : memref<1x96x4xf32, #tpu.memory_space<vmem>>, vector<1x94x4xf32>
    %17 = vector.shape_cast %16 : vector<1x94x4xf32> to vector<94x4xf32>
    %18 = arith.truncf %17 : vector<94x4xf32> to vector<94x4xbf16>
    %c2_16 = arith.constant 2 : index
    %c0_17 = arith.constant 0 : index
    %c0_18 = arith.constant 0 : index
    %19 = vector.load %arg5[%c2_16, %c0_17, %c0_18] : memref<3x4x96xbf16, #tpu.memory_space<vmem>>, vector<1x4x96xbf16>
    %20 = vector.shape_cast %19 : vector<1x4x96xbf16> to vector<4x96xbf16>
    %cst_19 = arith.constant dense<0.000000e+00> : vector<94x96xf32>
    %21 = tpu.matmul %18, %20, %cst_19 {dimension_numbers = #tpu.dot_dimension_numbers<[1], [0], [0], [1], [0, 0, 1, 1], [], []>} : vector<94x4xbf16>, vector<4x96xbf16>, vector<94x96xf32> -> vector<94x96xf32>
    %22 = arith.addf %15, %21 : vector<94x96xf32>
    %c0_20 = arith.constant 0 : index
    %c0_21 = arith.constant 0 : index
    %23 = vector.load %arg6[%c0_20, %c0_21] : memref<1x96xf32, #tpu.memory_space<vmem>>, vector<1x96xf32>
    %24 = vector.broadcast %23 : vector<1x96xf32> to vector<94x96xf32>
    %25 = arith.addf %22, %24 : vector<94x96xf32>
    %26 = vector.extract_strided_slice %25 {offsets = [0, 0], sizes = [94, 32], strides = [1, 1]} : vector<94x96xf32> to vector<94x32xf32>
    %27 = vector.extract_strided_slice %25 {offsets = [0, 32], sizes = [94, 32], strides = [1, 1]} : vector<94x96xf32> to vector<94x32xf32>
    %28 = vector.extract_strided_slice %25 {offsets = [0, 64], sizes = [94, 32], strides = [1, 1]} : vector<94x96xf32> to vector<94x32xf32>
    %29 = arith.negf %27 : vector<94x32xf32>
    %30 = math.exp %29 : vector<94x32xf32>
    %cst_22 = arith.constant 1.000000e+00 : f32
    %31 = vector.broadcast %cst_22 : f32 to vector<94x32xf32>
    %32 = arith.addf %31, %30 : vector<94x32xf32>
    %33 = arith.divf %31, %32 : vector<94x32xf32>
    %34 = arith.addf %26, %33 : vector<94x32xf32>
    %35 = arith.addf %34, %28 : vector<94x32xf32>
    %cst_23 = arith.constant 0.000000e+00 : f32
    %36 = vector.broadcast %cst_23 : f32 to vector<94x32xf32>
    %37 = arith.maximumf %35, %36 : vector<94x32xf32>
    %38 = vector.broadcast %0 : vector<94x1xf32> to vector<94x32xf32>
    %39 = arith.mulf %37, %38 : vector<94x32xf32>
    %cst_24 = arith.constant dense<0.000000e+00> : vector<32xf32>
    %40 = vector.multi_reduction <add>, %39, %cst_24 [0] : vector<94x32xf32> to vector<32xf32>
    %41 = vector.shape_cast %40 : vector<32xf32> to vector<1x32xf32>
    %cst_25 = arith.constant 1.250000e-02 : f32
    %42 = vector.broadcast %cst_25 : f32 to vector<1x32xf32>
    %43 = arith.mulf %41, %42 : vector<1x32xf32>
    %44 = arith.truncf %43 : vector<1x32xf32> to vector<1x32xbf16>
    %c0_26 = arith.constant 0 : index
    %c0_27 = arith.constant 0 : index
    %45 = vector.load %arg7[%c0_26, %c0_27] : memref<32x2xf32, #tpu.memory_space<vmem>>, vector<32x2xf32>
    %46 = arith.truncf %45 : vector<32x2xf32> to vector<32x2xbf16>
    %cst_28 = arith.constant dense<0.000000e+00> : vector<1x2xf32>
    %47 = tpu.matmul %44, %46, %cst_28 {dimension_numbers = #tpu.dot_dimension_numbers<[1], [0], [0], [1], [0, 0, 1, 1], [], []>} : vector<1x32xbf16>, vector<32x2xbf16>, vector<1x2xf32> -> vector<1x2xf32>
    %c0_29 = arith.constant 0 : index
    %c0_30 = arith.constant 0 : index
    %48 = vector.load %arg8[%c0_29, %c0_30] : memref<1x2xf32, #tpu.memory_space<vmem>>, vector<1x2xf32>
    %49 = arith.addf %47, %48 : vector<1x2xf32>
    %cst_31 = arith.constant 0.000000e+00 : f32
    %50 = vector.broadcast %cst_31 : f32 to vector<1x2xf32>
    %51 = arith.maximumf %49, %50 : vector<1x2xf32>
    %52 = arith.truncf %51 : vector<1x2xf32> to vector<1x2xbf16>
    %c0_32 = arith.constant 0 : index
    %c0_33 = arith.constant 0 : index
    %53 = vector.load %arg9[%c0_32, %c0_33] : memref<2x32xf32, #tpu.memory_space<vmem>>, vector<2x32xf32>
    %54 = arith.truncf %53 : vector<2x32xf32> to vector<2x32xbf16>
    %cst_34 = arith.constant dense<0.000000e+00> : vector<1x32xf32>
    %55 = tpu.matmul %52, %54, %cst_34 {dimension_numbers = #tpu.dot_dimension_numbers<[1], [0], [0], [1], [0, 0, 1, 1], [], []>} : vector<1x2xbf16>, vector<2x32xbf16>, vector<1x32xf32> -> vector<1x32xf32>
    %c0_35 = arith.constant 0 : index
    %c0_36 = arith.constant 0 : index
    %56 = vector.load %arg10[%c0_35, %c0_36] : memref<1x32xf32, #tpu.memory_space<vmem>>, vector<1x32xf32>
    %57 = arith.addf %55, %56 : vector<1x32xf32>
    %58 = arith.negf %57 : vector<1x32xf32>
    %59 = math.exp %58 : vector<1x32xf32>
    %cst_37 = arith.constant 1.000000e+00 : f32
    %60 = vector.broadcast %cst_37 : f32 to vector<1x32xf32>
    %61 = arith.addf %60, %59 : vector<1x32xf32>
    %62 = arith.divf %60, %61 : vector<1x32xf32>
    %63 = vector.broadcast %62 : vector<1x32xf32> to vector<94x32xf32>
    %64 = arith.mulf %37, %63 : vector<94x32xf32>
    %65 = arith.truncf %64 : vector<94x32xf32> to vector<94x32xbf16>
    %c0_38 = arith.constant 0 : index
    %c0_39 = arith.constant 0 : index
    %66 = vector.load %arg11[%c0_38, %c0_39] : memref<32x16xbf16, #tpu.memory_space<vmem>>, vector<32x16xbf16>
    %cst_40 = arith.constant dense<0.000000e+00> : vector<94x16xf32>
    %67 = tpu.matmul %65, %66, %cst_40 {dimension_numbers = #tpu.dot_dimension_numbers<[1], [0], [0], [1], [0, 0, 1, 1], [], []>} : vector<94x32xbf16>, vector<32x16xbf16>, vector<94x16xf32> -> vector<94x16xf32>
    %c0_41 = arith.constant 0 : index
    %c0_42 = arith.constant 0 : index
    %68 = vector.load %arg4[%c0_41, %c0_42] : memref<96x94xbf16, #tpu.memory_space<vmem>>, vector<96x94xbf16>
    %69 = arith.truncf %67 : vector<94x16xf32> to vector<94x16xbf16>
    %cst_43 = arith.constant dense<0.000000e+00> : vector<96x16xf32>
    %70 = tpu.matmul %68, %69, %cst_43 {dimension_numbers = #tpu.dot_dimension_numbers<[1], [0], [0], [1], [0, 0, 1, 1], [], []>} : vector<96x94xbf16>, vector<94x16xbf16>, vector<96x16xf32> -> vector<96x16xf32>
    %cst_44 = arith.constant 0.000000e+00 : f32
    %71 = vector.broadcast %cst_44 : f32 to vector<96x16xf32>
    %72 = arith.maximumf %70, %71 : vector<96x16xf32>
    %73 = arith.truncf %72 : vector<96x16xf32> to vector<96x16xbf16>
    %c0_45 = arith.constant 0 : index
    %c0_46 = arith.constant 0 : index
    %74 = vector.load %arg3[%c0_45, %c0_46] : memref<94x1xf32, #tpu.memory_space<vmem>>, vector<94x1xf32>
    %cst_47 = arith.constant 0.000000e+00 : f32
    %75 = vector.broadcast %cst_47 : f32 to vector<94x96xf32>
    %76 = vector.extract_strided_slice %73 {offsets = [0, 0], sizes = [94, 16], strides = [1, 1]} : vector<96x16xbf16> to vector<94x16xbf16>
    %c0_48 = arith.constant 0 : index
    %c0_49 = arith.constant 0 : index
    %c0_50 = arith.constant 0 : index
    %77 = vector.load %arg12[%c0_48, %c0_49, %c0_50] : memref<3x16x96xbf16, #tpu.memory_space<vmem>>, vector<1x16x96xbf16>
    %78 = vector.shape_cast %77 : vector<1x16x96xbf16> to vector<16x96xbf16>
    %cst_51 = arith.constant dense<0.000000e+00> : vector<94x96xf32>
    %79 = tpu.matmul %76, %78, %cst_51 {dimension_numbers = #tpu.dot_dimension_numbers<[1], [0], [0], [1], [0, 0, 1, 1], [], []>} : vector<94x16xbf16>, vector<16x96xbf16>, vector<94x96xf32> -> vector<94x96xf32>
    %80 = arith.addf %75, %79 : vector<94x96xf32>
    %81 = vector.extract_strided_slice %73 {offsets = [1, 0], sizes = [94, 16], strides = [1, 1]} : vector<96x16xbf16> to vector<94x16xbf16>
    %c1_52 = arith.constant 1 : index
    %c0_53 = arith.constant 0 : index
    %c0_54 = arith.constant 0 : index
    %82 = vector.load %arg12[%c1_52, %c0_53, %c0_54] : memref<3x16x96xbf16, #tpu.memory_space<vmem>>, vector<1x16x96xbf16>
    %83 = vector.shape_cast %82 : vector<1x16x96xbf16> to vector<16x96xbf16>
    %cst_55 = arith.constant dense<0.000000e+00> : vector<94x96xf32>
    %84 = tpu.matmul %81, %83, %cst_55 {dimension_numbers = #tpu.dot_dimension_numbers<[1], [0], [0], [1], [0, 0, 1, 1], [], []>} : vector<94x16xbf16>, vector<16x96xbf16>, vector<94x96xf32> -> vector<94x96xf32>
    %85 = arith.addf %80, %84 : vector<94x96xf32>
    %86 = vector.extract_strided_slice %73 {offsets = [2, 0], sizes = [94, 16], strides = [1, 1]} : vector<96x16xbf16> to vector<94x16xbf16>
    %c2_56 = arith.constant 2 : index
    %c0_57 = arith.constant 0 : index
    %c0_58 = arith.constant 0 : index
    %87 = vector.load %arg12[%c2_56, %c0_57, %c0_58] : memref<3x16x96xbf16, #tpu.memory_space<vmem>>, vector<1x16x96xbf16>
    %88 = vector.shape_cast %87 : vector<1x16x96xbf16> to vector<16x96xbf16>
    %cst_59 = arith.constant dense<0.000000e+00> : vector<94x96xf32>
    %89 = tpu.matmul %86, %88, %cst_59 {dimension_numbers = #tpu.dot_dimension_numbers<[1], [0], [0], [1], [0, 0, 1, 1], [], []>} : vector<94x16xbf16>, vector<16x96xbf16>, vector<94x96xf32> -> vector<94x96xf32>
    %90 = arith.addf %85, %89 : vector<94x96xf32>
    %c0_60 = arith.constant 0 : index
    %c0_61 = arith.constant 0 : index
    %91 = vector.load %arg13[%c0_60, %c0_61] : memref<1x96xf32, #tpu.memory_space<vmem>>, vector<1x96xf32>
    %92 = vector.broadcast %91 : vector<1x96xf32> to vector<94x96xf32>
    %93 = arith.addf %90, %92 : vector<94x96xf32>
    %94 = vector.extract_strided_slice %93 {offsets = [0, 0], sizes = [94, 32], strides = [1, 1]} : vector<94x96xf32> to vector<94x32xf32>
    %95 = vector.extract_strided_slice %93 {offsets = [0, 32], sizes = [94, 32], strides = [1, 1]} : vector<94x96xf32> to vector<94x32xf32>
    %96 = vector.extract_strided_slice %93 {offsets = [0, 64], sizes = [94, 32], strides = [1, 1]} : vector<94x96xf32> to vector<94x32xf32>
    %97 = arith.negf %95 : vector<94x32xf32>
    %98 = math.exp %97 : vector<94x32xf32>
    %cst_62 = arith.constant 1.000000e+00 : f32
    %99 = vector.broadcast %cst_62 : f32 to vector<94x32xf32>
    %100 = arith.addf %99, %98 : vector<94x32xf32>
    %101 = arith.divf %99, %100 : vector<94x32xf32>
    %102 = arith.addf %94, %101 : vector<94x32xf32>
    %103 = arith.addf %102, %96 : vector<94x32xf32>
    %cst_63 = arith.constant 0.000000e+00 : f32
    %104 = vector.broadcast %cst_63 : f32 to vector<94x32xf32>
    %105 = arith.maximumf %103, %104 : vector<94x32xf32>
    %106 = vector.broadcast %74 : vector<94x1xf32> to vector<94x32xf32>
    %107 = arith.mulf %105, %106 : vector<94x32xf32>
    %cst_64 = arith.constant dense<0.000000e+00> : vector<32xf32>
    %108 = vector.multi_reduction <add>, %107, %cst_64 [0] : vector<94x32xf32> to vector<32xf32>
    %109 = vector.shape_cast %108 : vector<32xf32> to vector<1x32xf32>
    %cst_65 = arith.constant 1.562500e-02 : f32
    %110 = vector.broadcast %cst_65 : f32 to vector<1x32xf32>
    %111 = arith.mulf %109, %110 : vector<1x32xf32>
    %112 = arith.truncf %111 : vector<1x32xf32> to vector<1x32xbf16>
    %c0_66 = arith.constant 0 : index
    %c0_67 = arith.constant 0 : index
    %113 = vector.load %arg14[%c0_66, %c0_67] : memref<32x2xf32, #tpu.memory_space<vmem>>, vector<32x2xf32>
    %114 = arith.truncf %113 : vector<32x2xf32> to vector<32x2xbf16>
    %cst_68 = arith.constant dense<0.000000e+00> : vector<1x2xf32>
    %115 = tpu.matmul %112, %114, %cst_68 {dimension_numbers = #tpu.dot_dimension_numbers<[1], [0], [0], [1], [0, 0, 1, 1], [], []>} : vector<1x32xbf16>, vector<32x2xbf16>, vector<1x2xf32> -> vector<1x2xf32>
    %c0_69 = arith.constant 0 : index
    %c0_70 = arith.constant 0 : index
    %116 = vector.load %arg15[%c0_69, %c0_70] : memref<1x2xf32, #tpu.memory_space<vmem>>, vector<1x2xf32>
    %117 = arith.addf %115, %116 : vector<1x2xf32>
    %cst_71 = arith.constant 0.000000e+00 : f32
    %118 = vector.broadcast %cst_71 : f32 to vector<1x2xf32>
    %119 = arith.maximumf %117, %118 : vector<1x2xf32>
    %120 = arith.truncf %119 : vector<1x2xf32> to vector<1x2xbf16>
    %c0_72 = arith.constant 0 : index
    %c0_73 = arith.constant 0 : index
    %121 = vector.load %arg16[%c0_72, %c0_73] : memref<2x32xf32, #tpu.memory_space<vmem>>, vector<2x32xf32>
    %122 = arith.truncf %121 : vector<2x32xf32> to vector<2x32xbf16>
    %cst_74 = arith.constant dense<0.000000e+00> : vector<1x32xf32>
    %123 = tpu.matmul %120, %122, %cst_74 {dimension_numbers = #tpu.dot_dimension_numbers<[1], [0], [0], [1], [0, 0, 1, 1], [], []>} : vector<1x2xbf16>, vector<2x32xbf16>, vector<1x32xf32> -> vector<1x32xf32>
    %c0_75 = arith.constant 0 : index
    %c0_76 = arith.constant 0 : index
    %124 = vector.load %arg17[%c0_75, %c0_76] : memref<1x32xf32, #tpu.memory_space<vmem>>, vector<1x32xf32>
    %125 = arith.addf %123, %124 : vector<1x32xf32>
    %126 = arith.negf %125 : vector<1x32xf32>
    %127 = math.exp %126 : vector<1x32xf32>
    %cst_77 = arith.constant 1.000000e+00 : f32
    %128 = vector.broadcast %cst_77 : f32 to vector<1x32xf32>
    %129 = arith.addf %128, %127 : vector<1x32xf32>
    %130 = arith.divf %128, %129 : vector<1x32xf32>
    %131 = vector.broadcast %130 : vector<1x32xf32> to vector<94x32xf32>
    %132 = arith.mulf %105, %131 : vector<94x32xf32>
    %133 = vector.extract_strided_slice %132 {offsets = [0, 0], sizes = [8, 32], strides = [1, 1]} : vector<94x32xf32> to vector<8x32xf32>
    %c0_78 = arith.constant 0 : index
    %c0_79 = arith.constant 0 : index
    %c0_80 = arith.constant 0 : index
    %c0_81 = arith.constant 0 : index
    %134 = vector.load %arg18[%c0_78, %c0_79, %c0_80, %c0_81] : memref<8x1x8x32xf32, #tpu.memory_space<vmem>>, vector<1x1x8x32xf32>
    %135 = vector.shape_cast %134 : vector<1x1x8x32xf32> to vector<8x32xf32>
    %136 = vector.shape_cast %133 : vector<8x32xf32> to vector<1x1x8x32xf32>
    tpu.vector_store %arg18[%c0_78, %c0_79, %c0_80, %c0_81], %136 {strides = array<i32>} : memref<8x1x8x32xf32, #tpu.memory_space<vmem>>, vector<1x1x8x32xf32>,
    %137 = vector.extract_strided_slice %132 {offsets = [12, 0], sizes = [8, 32], strides = [1, 1]} : vector<94x32xf32> to vector<8x32xf32>
    %c1_82 = arith.constant 1 : index
    %c0_83 = arith.constant 0 : index
    %c0_84 = arith.constant 0 : index
    %c0_85 = arith.constant 0 : index
    %138 = vector.load %arg18[%c1_82, %c0_83, %c0_84, %c0_85] : memref<8x1x8x32xf32, #tpu.memory_space<vmem>>, vector<1x1x8x32xf32>
    %139 = vector.shape_cast %138 : vector<1x1x8x32xf32> to vector<8x32xf32>
    %140 = vector.shape_cast %137 : vector<8x32xf32> to vector<1x1x8x32xf32>
    tpu.vector_store %arg18[%c1_82, %c0_83, %c0_84, %c0_85], %140 {strides = array<i32>} : memref<8x1x8x32xf32, #tpu.memory_space<vmem>>, vector<1x1x8x32xf32>,
    %141 = vector.extract_strided_slice %132 {offsets = [24, 0], sizes = [8, 32], strides = [1, 1]} : vector<94x32xf32> to vector<8x32xf32>
    %c2_86 = arith.constant 2 : index
    %c0_87 = arith.constant 0 : index
    %c0_88 = arith.constant 0 : index
    %c0_89 = arith.constant 0 : index
    %142 = vector.load %arg18[%c2_86, %c0_87, %c0_88, %c0_89] : memref<8x1x8x32xf32, #tpu.memory_space<vmem>>, vector<1x1x8x32xf32>
    %143 = vector.shape_cast %142 : vector<1x1x8x32xf32> to vector<8x32xf32>
    %144 = vector.shape_cast %141 : vector<8x32xf32> to vector<1x1x8x32xf32>
    tpu.vector_store %arg18[%c2_86, %c0_87, %c0_88, %c0_89], %144 {strides = array<i32>} : memref<8x1x8x32xf32, #tpu.memory_space<vmem>>, vector<1x1x8x32xf32>,
    %145 = vector.extract_strided_slice %132 {offsets = [36, 0], sizes = [8, 32], strides = [1, 1]} : vector<94x32xf32> to vector<8x32xf32>
    %c3 = arith.constant 3 : index
    %c0_90 = arith.constant 0 : index
    %c0_91 = arith.constant 0 : index
    %c0_92 = arith.constant 0 : index
    %146 = vector.load %arg18[%c3, %c0_90, %c0_91, %c0_92] : memref<8x1x8x32xf32, #tpu.memory_space<vmem>>, vector<1x1x8x32xf32>
    %147 = vector.shape_cast %146 : vector<1x1x8x32xf32> to vector<8x32xf32>
    %148 = vector.shape_cast %145 : vector<8x32xf32> to vector<1x1x8x32xf32>
    tpu.vector_store %arg18[%c3, %c0_90, %c0_91, %c0_92], %148 {strides = array<i32>} : memref<8x1x8x32xf32, #tpu.memory_space<vmem>>, vector<1x1x8x32xf32>,
    %149 = vector.extract_strided_slice %132 {offsets = [48, 0], sizes = [8, 32], strides = [1, 1]} : vector<94x32xf32> to vector<8x32xf32>
    %c4 = arith.constant 4 : index
    %c0_93 = arith.constant 0 : index
    %c0_94 = arith.constant 0 : index
    %c0_95 = arith.constant 0 : index
    %150 = vector.load %arg18[%c4, %c0_93, %c0_94, %c0_95] : memref<8x1x8x32xf32, #tpu.memory_space<vmem>>, vector<1x1x8x32xf32>
    %151 = vector.shape_cast %150 : vector<1x1x8x32xf32> to vector<8x32xf32>
    %152 = vector.shape_cast %149 : vector<8x32xf32> to vector<1x1x8x32xf32>
    tpu.vector_store %arg18[%c4, %c0_93, %c0_94, %c0_95], %152 {strides = array<i32>} : memref<8x1x8x32xf32, #tpu.memory_space<vmem>>, vector<1x1x8x32xf32>,
    %153 = vector.extract_strided_slice %132 {offsets = [60, 0], sizes = [8, 32], strides = [1, 1]} : vector<94x32xf32> to vector<8x32xf32>
    %c5 = arith.constant 5 : index
    %c0_96 = arith.constant 0 : index
    %c0_97 = arith.constant 0 : index
    %c0_98 = arith.constant 0 : index
    %154 = vector.load %arg18[%c5, %c0_96, %c0_97, %c0_98] : memref<8x1x8x32xf32, #tpu.memory_space<vmem>>, vector<1x1x8x32xf32>
    %155 = vector.shape_cast %154 : vector<1x1x8x32xf32> to vector<8x32xf32>
    %156 = vector.shape_cast %153 : vector<8x32xf32> to vector<1x1x8x32xf32>
    tpu.vector_store %arg18[%c5, %c0_96, %c0_97, %c0_98], %156 {strides = array<i32>} : memref<8x1x8x32xf32, #tpu.memory_space<vmem>>, vector<1x1x8x32xf32>,
    %157 = vector.extract_strided_slice %132 {offsets = [72, 0], sizes = [8, 32], strides = [1, 1]} : vector<94x32xf32> to vector<8x32xf32>
    %c6 = arith.constant 6 : index
    %c0_99 = arith.constant 0 : index
    %c0_100 = arith.constant 0 : index
    %c0_101 = arith.constant 0 : index
    %158 = vector.load %arg18[%c6, %c0_99, %c0_100, %c0_101] : memref<8x1x8x32xf32, #tpu.memory_space<vmem>>, vector<1x1x8x32xf32>
    %159 = vector.shape_cast %158 : vector<1x1x8x32xf32> to vector<8x32xf32>
    %160 = vector.shape_cast %157 : vector<8x32xf32> to vector<1x1x8x32xf32>
    tpu.vector_store %arg18[%c6, %c0_99, %c0_100, %c0_101], %160 {strides = array<i32>} : memref<8x1x8x32xf32, #tpu.memory_space<vmem>>, vector<1x1x8x32xf32>,
    %161 = vector.extract_strided_slice %132 {offsets = [84, 0], sizes = [8, 32], strides = [1, 1]} : vector<94x32xf32> to vector<8x32xf32>
    %c7 = arith.constant 7 : index
    %c0_102 = arith.constant 0 : index
    %c0_103 = arith.constant 0 : index
    %c0_104 = arith.constant 0 : index
    %162 = vector.load %arg18[%c7, %c0_102, %c0_103, %c0_104] : memref<8x1x8x32xf32, #tpu.memory_space<vmem>>, vector<1x1x8x32xf32>
    %163 = vector.shape_cast %162 : vector<1x1x8x32xf32> to vector<8x32xf32>
    %164 = vector.shape_cast %161 : vector<8x32xf32> to vector<1x1x8x32xf32>
    tpu.vector_store %arg18[%c7, %c0_102, %c0_103, %c0_104], %164 {strides = array<i32>} : memref<8x1x8x32xf32, #tpu.memory_space<vmem>>, vector<1x1x8x32xf32>,
    return
  }
  func.func @transform_0(%arg0: i32) -> (i32, i32, i32) {
    %c0_i32 = arith.constant 0 : i32
    %c0_i32_0 = arith.constant 0 : i32
    %c0_i32_1 = arith.constant 0 : i32
    return %arg0, %c0_i32, %c0_i32_0 : i32, i32, i32
  }
  func.func @transform_1(%arg0: i32) -> (i32, i32) {
    %c0_i32 = arith.constant 0 : i32
    %c0_i32_0 = arith.constant 0 : i32
    %c0_i32_1 = arith.constant 0 : i32
    return %c0_i32, %c0_i32_0 : i32, i32
  }
  func.func @transform_2(%arg0: i32) -> (i32, i32) {
    %c0_i32 = arith.constant 0 : i32
    %c0_i32_0 = arith.constant 0 : i32
    %c0_i32_1 = arith.constant 0 : i32
    return %c0_i32, %c0_i32_0 : i32, i32
  }
  func.func @transform_3(%arg0: i32) -> (i32, i32) {
    %c0_i32 = arith.constant 0 : i32
    %c0_i32_0 = arith.constant 0 : i32
    %c0_i32_1 = arith.constant 0 : i32
    return %c0_i32, %c0_i32_0 : i32, i32
  }
  func.func @transform_4(%arg0: i32) -> (i32, i32, i32) {
    %c0_i32 = arith.constant 0 : i32
    %c0_i32_0 = arith.constant 0 : i32
    %c0_i32_1 = arith.constant 0 : i32
    %c0_i32_2 = arith.constant 0 : i32
    return %c0_i32, %c0_i32_0, %c0_i32_1 : i32, i32, i32
  }
  func.func @transform_5(%arg0: i32) -> (i32, i32) {
    %c0_i32 = arith.constant 0 : i32
    %c0_i32_0 = arith.constant 0 : i32
    %c0_i32_1 = arith.constant 0 : i32
    return %c0_i32, %c0_i32_0 : i32, i32
  }
  func.func @transform_6(%arg0: i32) -> (i32, i32) {
    %c0_i32 = arith.constant 0 : i32
    %c0_i32_0 = arith.constant 0 : i32
    %c0_i32_1 = arith.constant 0 : i32
    return %c0_i32, %c0_i32_0 : i32, i32
  }
  func.func @transform_7(%arg0: i32) -> (i32, i32) {
    %c0_i32 = arith.constant 0 : i32
    %c0_i32_0 = arith.constant 0 : i32
    %c0_i32_1 = arith.constant 0 : i32
    return %c0_i32, %c0_i32_0 : i32, i32
  }
  func.func @transform_8(%arg0: i32) -> (i32, i32) {
    %c0_i32 = arith.constant 0 : i32
    %c0_i32_0 = arith.constant 0 : i32
    %c0_i32_1 = arith.constant 0 : i32
    return %c0_i32, %c0_i32_0 : i32, i32
  }
  func.func @transform_9(%arg0: i32) -> (i32, i32) {
    %c0_i32 = arith.constant 0 : i32
    %c0_i32_0 = arith.constant 0 : i32
    %c0_i32_1 = arith.constant 0 : i32
    return %c0_i32, %c0_i32_0 : i32, i32
  }
  func.func @transform_10(%arg0: i32) -> (i32, i32) {
    %c0_i32 = arith.constant 0 : i32
    %c0_i32_0 = arith.constant 0 : i32
    %c0_i32_1 = arith.constant 0 : i32
    return %c0_i32, %c0_i32_0 : i32, i32
  }
  func.func @transform_11(%arg0: i32) -> (i32, i32, i32) {
    %c0_i32 = arith.constant 0 : i32
    %c0_i32_0 = arith.constant 0 : i32
    %c0_i32_1 = arith.constant 0 : i32
    %c0_i32_2 = arith.constant 0 : i32
    return %c0_i32, %c0_i32_0, %c0_i32_1 : i32, i32, i32
  }
  func.func @transform_12(%arg0: i32) -> (i32, i32) {
    %c0_i32 = arith.constant 0 : i32
    %c0_i32_0 = arith.constant 0 : i32
    %c0_i32_1 = arith.constant 0 : i32
    return %c0_i32, %c0_i32_0 : i32, i32
  }
  func.func @transform_13(%arg0: i32) -> (i32, i32) {
    %c0_i32 = arith.constant 0 : i32
    %c0_i32_0 = arith.constant 0 : i32
    %c0_i32_1 = arith.constant 0 : i32
    return %c0_i32, %c0_i32_0 : i32, i32
  }
  func.func @transform_14(%arg0: i32) -> (i32, i32) {
    %c0_i32 = arith.constant 0 : i32
    %c0_i32_0 = arith.constant 0 : i32
    %c0_i32_1 = arith.constant 0 : i32
    return %c0_i32, %c0_i32_0 : i32, i32
  }
  func.func @transform_15(%arg0: i32) -> (i32, i32) {
    %c0_i32 = arith.constant 0 : i32
    %c0_i32_0 = arith.constant 0 : i32
    %c0_i32_1 = arith.constant 0 : i32
    return %c0_i32, %c0_i32_0 : i32, i32
  }
  func.func @transform_16(%arg0: i32) -> (i32, i32) {
    %c0_i32 = arith.constant 0 : i32
    %c0_i32_0 = arith.constant 0 : i32
    %c0_i32_1 = arith.constant 0 : i32
    return %c0_i32, %c0_i32_0 : i32, i32
  }
  func.func @transform_17(%arg0: i32) -> (i32, i32, i32, i32) {
    %c0_i32 = arith.constant 0 : i32
    %c0_i32_0 = arith.constant 0 : i32
    %c0_i32_1 = arith.constant 0 : i32
    %c0_i32_2 = arith.constant 0 : i32
    return %c0_i32, %arg0, %c0_i32_0, %c0_i32_1 : i32, i32, i32, i32
  }
}

</mosaic_0001>

<bundles_post_ra>
// kernel: stgcn_block_forward.3
= control target key start
LH: loop header
LB: loop body
LE: loop exit
PB: predicated region body
PF: predicated region fallthrough
CT: control target
= control target key end

     0   :  { %v81_v7 = vmov 0   ;;  %s132_s0 = inlined_call_operand.vmem [shape: f32[8,512], index: 0, kind: input, shape index: {}]   ;;  %s133_s1 = inlined_call_operand.vmem [shape: f32[8,1], index: 1, kind: input, shape index: {}]   ;;  %s134_s2 = inlined_call_operand.vmem [shape: f32[8,1], index: 2, kind: input, shape index: {}]   ;;  %s135_s3 = inlined_call_operand.vmem [shape: f32[2,8,256], index: 3, kind: output, shape index: {}]  }
   0x1   :  { %v14_v0 = vld [vmem:[%s132_s0] sm:$0xff]  ;;  %v15_v1 = vld [vmem:[%s132_s0 + $0x8] sm:$0xff]  ;;  %v16_v2 = vld [vmem:[%s132_s0 + $0x10] sm:$0xff]  ;;  %77 = vset.pattern.permute.xlu1 %v81_v7  ;;  %78 = vset.pattern.permute.xlu0 %v81_v7 }
   0x2   :  { %v18_v3 = vadd.f32 %v15_v1, %v14_v0  ;;  %v17_v4 = vld [vmem:[%s132_s0 + $0x18] sm:$0xff]  ;;  %v45_v8 = vld [vmem:[%s133_s1] sm:$0xff] }
   0x3   :  { %48 = vperm.xlu1 %77, %v45_v8   ;;  %v55_v9 = vld [vmem:[%s134_s2] sm:$0xff] }
   0x4   :  { %v19_v5 = vadd.f32 %v18_v3, %v16_v2 }
   0x6   :  { %v20_v6 = vadd.f32 %v19_v5, %v17_v4 }
   0x7   :  { %58 = vperm.xlu1 %77, %v55_v9  }
   0x8   :  { %21 = vadd.xlane.f32.xlu0 %v20_v6 }
  0x82   :  { %v49_v26 = vpop.permute.xlu1 %48 }
  0x86   :  { %v59_v36 = vpop.permute.xlu1 %58 }
  0x95   :  { %v22_v10 = vpop.xlane.xlu0 %21 }
  0x96   :  { %v24_v11 = vmul.f32 0.001953125, %v22_v10 }
  0x98   :  { %v25_v12 = vsub.f32 %v14_v0, %v24_v11  ;;  %v26_v13 = vsub.f32 %v15_v1, %v24_v11  ;;  %v27_v14 = vsub.f32 %v16_v2, %v24_v11  ;;  %v28_v15 = vsub.f32 %v17_v4, %v24_v11 }
  0x9a   :  { %v29_v16 = vmul.f32 %v25_v12, %v25_v12  ;;  %v30_v17 = vmul.f32 %v26_v13, %v26_v13  ;;  %v31_v18 = vmul.f32 %v27_v14, %v27_v14  ;;  %v32_v20 = vmul.f32 %v28_v15, %v28_v15 }
  0x9c   :  { %v33_v19 = vadd.f32 %v30_v17, %v29_v16 }
  0x9e   :  { %v34_v21 = vadd.f32 %v33_v19, %v31_v18 }
  0xa0   :  { %v35_v22 = vadd.f32 %v34_v21, %v32_v20 }
  0xa2   :  { %36 = vadd.xlane.f32.xlu0 %v35_v22 }
 0x12f   :  { %v37_v23 = vpop.xlane.xlu0 %36 }
 0x130   :  { %v38_v24 = vmul.f32 0.001953125, %v37_v23 }
 0x132   :  { %v39_v25 = vadd.f32 1e-05, %v38_v24 }
 0x134   :  { %79 = vrsqrt.f32 %v39_v25 }
 0x13e   :  { %v80_v27 = vpop.eup %79 }
 0x13f   :  { %v41_v28 = vmul.f32 %v80_v27, %v25_v12  ;;  %v42_v29 = vmul.f32 %v80_v27, %v26_v13  ;;  %v43_v30 = vmul.f32 %v80_v27, %v27_v14  ;;  %v44_v31 = vmul.f32 %v80_v27, %v28_v15 }
 0x141   :  { %v51_v32 = vmul.f32 %v49_v26, %v41_v28  ;;  %v52_v33 = vmul.f32 %v49_v26, %v42_v29  ;;  %v53_v34 = vmul.f32 %v49_v26, %v43_v30  ;;  %v54_v35 = vmul.f32 %v49_v26, %v44_v31 }
 0x143   :  { %v61_v37 = vadd.f32 %v59_v36, %v51_v32  ;;  %v62_v38 = vadd.f32 %v59_v36, %v52_v33  ;;  %v63_v39 = vadd.f32 %v59_v36, %v53_v34  ;;  %v64_v40 = vadd.f32 %v59_v36, %v54_v35 }
 0x145   :  { %65 = vst [vmem:[%s135_s3] sm:$0xff] %v61_v37  ;;  %66 = vst [vmem:[%s135_s3 + $0x8] sm:$0xff] %v62_v38 }
 0x146   :  { %74 = vst [vmem:[%s135_s3 + $0x10] sm:$0xff] %v63_v39  ;;  %75 = vst [vmem:[%s135_s3 + $0x18] sm:$0xff] %v64_v40 }

// kernel: stgcn_block_forward.2
= control target key start
LH: loop header
LB: loop body
LE: loop exit
PB: predicated region body
PF: predicated region fallthrough
CT: control target
= control target key end

     0   :  { %s4105_s0 = inlined_call_operand.vmem [shape: f32[2,96,4], index: 0, kind: input, shape index: {}]   ;;  %s4106_s1 = inlined_call_operand.vmem [shape: f32[94,1], index: 1, kind: input, shape index: {}]   ;;  %s4107_s2 = inlined_call_operand.vmem [shape: f32[94,1], index: 2, kind: input, shape index: {}]   ;;  %s4108_s3 = inlined_call_operand.vmem [shape: bf16[96,94], index: 3, kind: input, shape index: {}]   ;;  %s4109_s4 = inlined_call_operand.vmem [shape: bf16[3,4,96], index: 4, kind: input, shape index: {}]   ;;  %s4110_s5 = inlined_call_operand.vmem [shape: f32[1,96], index: 5, kind: input, shape index: {}]   ;;  %s4111_s6 = inlined_call_operand.vmem [shape: f32[32,2], index: 6, kind: input, shape index: {}]   ;;  %s4112_s7 = inlined_call_operand.vmem [shape: f32[1,2], index: 7, kind: input, shape index: {}]   ;;  %s4113_s8 = inlined_call_operand.vmem [shape: f32[2,32], index: 8, kind: input, shape index: {}]   ;;  %s4114_s9 = inlined_call_operand.vmem [shape: f32[1,32], index: 9, kind: input, shape index: {}]   ;;  %s4115_s10 = inlined_call_operand.vmem [shape: bf16[32,16], index: 10, kind: input, shape index: {}]   ;;  %s4116_s11 = inlined_call_operand.vmem [shape: bf16[3,16,96], index: 11, kind: input, shape index: {}]   ;;  %s4117_s12 = inlined_call_operand.vmem [shape: f32[1,96], index: 12, kind: input, shape index: {}]   ;;  %s4118_s13 = inlined_call_operand.vmem [shape: f32[32,2], index: 13, kind: input, shape index: {}]   ;;  %s4119_s14 = inlined_call_operand.vmem [shape: f32[1,2], index: 14, kind: input, shape index: {}]   ;;  %s4120_s15 = inlined_call_operand.vmem [shape: f32[2,32], index: 15, kind: input, shape index: {}]   ;;  %s4121_s16 = inlined_call_operand.vmem [shape: f32[1,32], index: 16, kind: input, shape index: {}]   ;;  %s4122_s17 = inlined_call_operand.vmem [shape: f32[8,2,8,32], index: 17, kind: output, shape index: {}]  }
   0x1   :  { %4128 = sst [smem:[#allocation7_spill]] %s4105_s0 }
   0x2   :  { %4129 = sst [smem:[#allocation8_spill]] %s4106_s1 }
   0x3   :  { %4130 = sst [smem:[#allocation9_spill]] %s4122_s17 }
   0x4   :  { %s3337_s24 = smov 0   ;;  %s3339_s25 = smov 0  }
   0x5   :  { %s3341_s26 = smov 0  }
   0x6 LB: > { %4131 = sst [smem:[#allocation3_spill]] %s3236_s25  ;;  %s3350_s27 = sadd.s32 4294967295, %s3240_s26   ;;  %s3240_s26 = sphi %s3341_s26, %s4141_s26   ;;  %s3236_s25 = sphi %s3339_s25, %s4143_s25   ;;  %s3232_s24 = sphi %s3337_s24, %s4142_s24  }
   0x7   : > { %4132 = sst [smem:[#allocation4_spill]] %s3350_s27  ;;  %s3352_s28 = sadd.s32 1, %s3240_s26  }
   0x8   : > { %4133 = sst [smem:[#allocation5_spill]] %s3352_s28  ;;  %s393_s29 = ssub.s32 %s3240_s26, %s3352_s28 }
   0x9   : > { %s396_s0 = sadd.s32 1, %s3236_s25  ;;  %p394_p0 = scmp.eq.s32.totalorder %s393_s29, 0 }
   0xa   : > { %p406_p1 = scmp.ne.s32.totalorder %s3236_s25, %s3232_s24  ;;  %p407_p2 = scmp.eq.s32.totalorder %s3350_s27, 1 }
   0xb   : > { %p2680_p3 = scmp.ge.s32.totalorder %s3240_s26, 1  ;;  %p487_p5 = scmp.lt.s32.totalorder %s3240_s26, 3 }
   0xc   : > { %s3360_s30 = scalar_select %p394_p0, %s3236_s25, %s396_s0  }
   0xd   : > { %p3362_p4 = por %p407_p2, %p406_p1  ;;  %p488_p6 = pnand %p2680_p3, %p487_p5 }
   0xe   : > { %4134 = sst [smem:[#allocation6_spill]] %s3360_s30  ;;  %v2683_v0 = vld [vmem:[%s4109_s4 + $0x2] sm:$0x3] (!%p488_p6)  ;;  %vm614_vm0 = vcmask (!%p488_p6), 1041408   ;;  %p538_p7 = scmp.lt.s32.totalorder (!%p488_p6), %s3350_s27, 1  ;;  %v3242_v3 = vmov (!%p488_p6), 0  }
   0xf   : > { %491 = sbr.rel (%p488_p6) target bundleno = 2391 (0x957), region = 88  ;;  %3067 = vmatprep.subr.msk.bf16.mxu0 (!%p488_p6), %vm614_vm0, %v2683_v0  ;;  %v616_v1 = vsel (!%p488_p6), %vm614_vm0, %v2683_v0, 0  ;;  %v574_v2 = vld [vmem:[%s4109_s4] sm:$0x3] (!%p488_p6)  ;;  %3101 = vset.pattern.permute.xlu0 (!%p488_p6), %v3242_v3  ;;  %s4136_s26 = sld [smem:[#allocation8_spill]] (!%p488_p6)  ;;  %vm595_vm1 = vcmask (!%p488_p6), 31744  }
  0x10   : > { %2868 = vmatpush3.bf16.msra.mxu0 (!%p488_p6), %v616_v1  ;;  %3102 = vset.pattern.permute.xlu1 (!%p488_p6), %v3242_v3  ;;  %v718_v17 = vsel (!%p488_p6), %vm614_vm0, %v574_v2, 0  ;;  %v2696_v19 = vld [vmem:[%s4109_s4 + $0x4] sm:$0x3] (!%p488_p6)  ;;  %s3244_s30 = smov (!%p488_p6), 96   ;;  %vm3246_vm2 = vmmov (!%p488_p6), 0   ;;  %vm1230_vm3 = vcmask (!%p488_p6), 261120  }
  0x11   : > { %3068 = vmatprep.subr.msk.bf16.mxu0 (!%p488_p6), %vm614_vm0, %v574_v2  ;;  %v840_v44 = vsel (!%p488_p6), %vm614_vm0, %v2696_v19, 0  ;;  %vm1252_vm4 = vcmask (!%p488_p6), 259072   ;;  %vm1322_vm5 = vcmask (!%p488_p6), 1040384   ;;  %vm1318_vm6 = vcmask (!%p488_p6), 15360   ;;  %s535_s28 = sand.u32 (!%p488_p6), 1, %s3232_s24  }
  0x12   : > { %vm1557_vm7 = vcmask (!%p488_p6), 769024   ;;  %vm1576_vm8 = vcmask (!%p488_p6), 1046528   ;;  %vm1696_vm9 = vsmask.f32 (!%p488_p6), 7424  ;;  %vm1750_vm10 = vcmask (!%p488_p6), 130048  }
  0x13   : > { %vm2538_vm11 = vcmask (!%p488_p6), 261124   ;;  %vm2540_vm12 = vcmask (!%p488_p6), 257024  }
  0x15   : > { %s4137_s29 = smov (!%p488_p6), %s4136_s26  ;;  %v544_v4 = vld [vmem:[%s4136_s26] sm:$0xff] (!%p488_p6) }
  0x16   : > { %s539_s0 = scalar_select %p538_p7, %s3350_s27, 1  ;;  %1160 = vperm.xlu0 %3101, %v544_v4   ;;  %v545_v5 = vld [vmem:[%s4137_s29 + $0x8] sm:$0xff]  ;;  %v548_v6 = vld [vmem:[%s4137_s29 + $0x20] sm:$0xff]  ;;  %v546_v7 = vld [vmem:[%s4137_s29 + $0x10] sm:$0xff] }
  0x17   : > { %1180 = vperm.xlu1 %3102, %v548_v6   ;;  %v550_v8 = vld [vmem:[%s4137_s29 + $0x30] sm:$0xff]  ;;  %s4138_s27 = sld [smem:[#allocation7_spill]]  ;;  %v552_v20 = vld [vmem:[%s4137_s29 + $0x40] sm:$0xff]  ;;  %v547_v21 = vld [vmem:[%s4137_s29 + $0x18] sm:$0xff]  ;;  %s4139_s1 = sld [smem:[#allocation4_spill]] (%p3362_p4) }
  0x18   : > { %s3071_s20 = smul.u32 96, %s539_s0  ;;  %v554_v26 = vld [vmem:[%s4137_s29 + $0x50] sm:$0xff]  ;;  %v549_v28 = vld [vmem:[%s4137_s29 + $0x28] sm:$0xff]  ;;  %v551_v32 = vld [vmem:[%s4137_s29 + $0x38] sm:$0xff]  ;;  %s2681_s0 = sshll.u32 %s535_s28, 6 }
  0x19   : > { %v553_v35 = vld [vmem:[%s4137_s29 + $0x48] sm:$0xff]  ;;  %s537_s24 = scalar_lea.vmem [#allocation2], %s2681_s0  ;;  %s4140_s22 = sld [smem:[#allocation9_spill]] (%p3362_p4) }
  0x1a   : > { %1165 = vperm.xlu0 %3101, %v545_v5  }
  0x1b   : > { %1190 = vperm.xlu1 %3102, %v550_v8   ;;  %v3478_v8 = vld [vmem:[%s4110_s5] ss:$0 sm:$0xff] }
  0x1d   : > { %s3395_s19 = scalar_lea.vmem %s4138_s27, %s3071_s20  ;;  %s2792_s20 = sshll.u32 (%p3362_p4), %s4139_s1, 3 }
  0x1e   : > { %v575_v9 = vld [vmem:[%s3395_s19 + $0x1] sm:$0xff]  ;;  %v576_v10 = vld [vmem:[%s3395_s19 + $0x9] sm:$0xff]  ;;  %v577_v11 = vld [vmem:[%s3395_s19 + $0x11] sm:$0xff]  ;;  %1170 = vperm.xlu0 %3101, %v546_v7  }
  0x1f   : > { %v587_v12 = vpack.c.bf16 %v576_v10, %v575_v9  ;;  %v578_v13 = vld [vmem:[%s3395_s19 + $0x19] sm:$0xff]  ;;  %v579_v14 = vld [vmem:[%s3395_s19 + $0x21] sm:$0xff]  ;;  %v580_v15 = vld [vmem:[%s3395_s19 + $0x29] sm:$0xff]  ;;  %1200 = vperm.xlu1 %3102, %v552_v20  }
  0x20   : > { %v588_v16 = vpack.c.bf16 %v578_v13, %v577_v11  ;;  %v589_v18 = vpack.c.bf16 %v580_v15, %v579_v14  ;;  %v581_v22 = vld [vmem:[%s3395_s19 + $0x31] sm:$0xff]  ;;  %v582_v23 = vld [vmem:[%s3395_s19 + $0x39] sm:$0xff]  ;;  %v583_v24 = vld [vmem:[%s3395_s19 + $0x41] sm:$0xff] }
  0x21   : > { %2869 = vmatprep.mubr.msk.bf16.mxu0 %vm595_vm1, %v587_v12  ;;  %v584_v25 = vld [vmem:[%s3395_s19 + $0x49] sm:$0xff]  ;;  %v590_v27 = vpack.c.bf16 %v582_v23, %v581_v22  ;;  %v585_v30 = vld [vmem:[%s3395_s19 + $0x51] sm:$0xff]  ;;  %v586_v31 = vld [vmem:[%s3395_s19 + $0x59] sm:$0x3f] }
  0x22   : > { %2870 = vmatmul.mubr.msk.bf16.vlgmr.msra.gmra.mrb[0].mxu0 %vm595_vm1, %v588_v16  ;;  %1175 = vperm.xlu0 %3101, %v547_v21   ;;  %v591_v29 = vpack.c.bf16 %v584_v25, %v583_v24  ;;  %v556_v33 = vld [vmem:[%s3395_s19] sm:$0xff]  ;;  %v557_v34 = vld [vmem:[%s3395_s19 + $0x8] sm:$0xff]  ;;  %v592_v36 = vpack.c.bf16 %v586_v31, %v585_v30  ;;  %v558_v38 = vld [vmem:[%s3395_s19 + $0x10] sm:$0xff] }
  0x23   : > { %2882 = vmatpush3.bf16.msra.mxu0 %v718_v17  ;;  %2873 = vmatprep.mubr.msk.bf16.mxu0 %vm595_vm1, %v589_v18  ;;  %v568_v37 = vpack.c.bf16 %v557_v34, %v556_v33  ;;  %v559_v39 = vld [vmem:[%s3395_s19 + $0x18] sm:$0xff]  ;;  %v560_v40 = vld [vmem:[%s3395_s19 + $0x20] sm:$0xff]  ;;  %v561_v41 = vld [vmem:[%s3395_s19 + $0x28] sm:$0xff] }
  0x24   : > { %3069 = vmatprep.subr.msk.bf16.mxu0 %vm614_vm0, %v2696_v19  ;;  %1210 = vperm.xlu1 %3102, %v554_v26   ;;  %v569_v42 = vpack.c.bf16 %v559_v39, %v558_v38  ;;  %v570_v43 = vpack.c.bf16 %v561_v41, %v560_v40  ;;  %v562_v45 = vld [vmem:[%s3395_s19 + $0x30] sm:$0xff]  ;;  %v563_v46 = vld [vmem:[%s3395_s19 + $0x38] sm:$0xff]  ;;  %v564_v47 = vld [vmem:[%s3395_s19 + $0x40] sm:$0xff] }
  0x25   : > { %v565_v48 = vld [vmem:[%s3395_s19 + $0x48] sm:$0xff]  ;;  %v571_v49 = vpack.c.bf16 %v563_v46, %v562_v45  ;;  %v566_v51 = vld [vmem:[%s3395_s19 + $0x50] sm:$0xff]  ;;  %v567_v52 = vld [vmem:[%s3395_s19 + $0x58] sm:$0x3f] }
  0x26   : > { %1185 = vperm.xlu0 %3101, %v549_v28   ;;  %v572_v50 = vpack.c.bf16 %v565_v48, %v564_v47  ;;  %v801_v53 = vld [vmem:[%s3395_s19 + $0x2] sm:$0xff]  ;;  %v802_v54 = vld [vmem:[%s3395_s19 + $0xa] sm:$0xff]  ;;  %v573_v55 = vpack.c.bf16 %v567_v52, %v566_v51  ;;  %v803_v57 = vld [vmem:[%s3395_s19 + $0x12] sm:$0xff] }
  0x27   : > { %v813_v56 = vpack.c.bf16 %v802_v54, %v801_v53  ;;  %v804_v58 = vld [vmem:[%s3395_s19 + $0x1a] sm:$0xff]  ;;  %v805_v59 = vld [vmem:[%s3395_s19 + $0x22] sm:$0xff]  ;;  %v806_v60 = vld [vmem:[%s3395_s19 + $0x2a] sm:$0xff] }
  0x28   : > { %v814_v61 = vpack.c.bf16 %v804_v58, %v803_v57  ;;  %v815_v62 = vpack.c.bf16 %v806_v60, %v805_v59  ;;  %v807_v63 = vld [vmem:[%s3395_s19 + $0x32] sm:$0xff]  ;;  %v808_v0 = vld [vmem:[%s3395_s19 + $0x3a] sm:$0xff]  ;;  %v809_v1 = vld [vmem:[%s3395_s19 + $0x42] sm:$0xff] }
  0x29   : > { %v810_v2 = vld [vmem:[%s3395_s19 + $0x4a] sm:$0xff]  ;;  %v816_v3 = vpack.c.bf16 %v808_v0, %v807_v63  ;;  %v811_v5 = vld [vmem:[%s3395_s19 + $0x52] sm:$0xff]  ;;  %v812_v6 = vld [vmem:[%s3395_s19 + $0x5a] sm:$0x3f]  ;;  %s3243_s19 = smov 64  }
  0x2a   : > { %2874 = vmatmul.mubr.msk.bf16.gmra.mrb[4].mxu0 %vm595_vm1, %v590_v27  ;;  %1195 = vperm.xlu0 %3101, %v551_v32   ;;  %v817_v4 = vpack.c.bf16 %v810_v2, %v809_v1  ;;  %v818_v7 = vpack.c.bf16 %v812_v6, %v811_v5 }
  0x2b   : > { %2877 = vmatprep.mubr.msk.bf16.mxu0 %vm595_vm1, %v591_v29 }
  0x2e   : > { %1205 = vperm.xlu0 %3101, %v553_v35  }
  0x32   : > { %2878 = vmatmul.mubr.msk.bf16.gmra.mrb[8].mxu0 %vm595_vm1, %v592_v36 }
  0x33   : > { %2883 = vmatprep.mubr.msk.bf16.mxu0 %vm595_vm1, %v568_v37 }
  0x3a   : > { %2884 = vmatmul.mubr.msk.bf16.vlgmr.msra.gmra.mrb[0].mxu0 %vm595_vm1, %v569_v42 }
  0x3b   : > { %2896 = vmatpush3.bf16.msra.mxu0 %v840_v44  ;;  %2887 = vmatprep.mubr.msk.bf16.mxu0 %vm595_vm1, %v570_v43 }
  0x42   : > { %2888 = vmatmul.mubr.msk.bf16.gmra.mrb[4].mxu0 %vm595_vm1, %v571_v49 }
  0x43   : > { %2891 = vmatprep.mubr.msk.bf16.mxu0 %vm595_vm1, %v572_v50 }
  0x4a   : > { %2892 = vmatmul.mubr.msk.bf16.gmra.mrb[8].mxu0 %vm595_vm1, %v573_v55 }
  0x4b   : > { %2897 = vmatprep.mubr.msk.bf16.mxu0 %vm595_vm1, %v813_v56 }
  0x52   : > { %2898 = vmatmul.mubr.msk.bf16.vlgmr.msra.gmra.mrb[0].mxu0 %vm595_vm1, %v814_v61 }
  0x53   : > { %2901 = vmatprep.mubr.msk.bf16.mxu0 %vm595_vm1, %v815_v62 }
  0x5a   : > { %2902 = vmatmul.mubr.msk.bf16.gmra.mrb[4].mxu0 %vm595_vm1, %v816_v3 }
  0x5b   : > { %2905 = vmatprep.mubr.msk.bf16.mxu0 %vm595_vm1, %v817_v4 }
  0x62   : > { %2906 = vmatmul.mubr.msk.bf16.gmra.mrb[8].mxu0 %vm595_vm1, %v818_v7 }
 0x125   : > { %v2899_v9 = vpop.f32.mrb[0].mxu0 }
 0x126   : > { %v3481_v10 = vadd.f32 %v2899_v9, %v3478_v8  ;;  %v876_v11 = vpop.f32.mrb[1].mxu0 }
 0x127   : > { %v3484_v12 = vadd.f32 %v3478_v8, %v876_v11  ;;  %v2900_v13 = vpop.f32.mrb[2].mxu0 }
 0x128   : > { %v2706_v14 = vmul.f32 -1.442695, %v3481_v10  ;;  %v3488_v15 = vadd.f32 %v2900_v13, %v3478_v8  ;;  %1102 = vrot.lane.b32.xlu0 %v3481_v10, %s3243_s19  ;;  %v879_v16 = vpop.f32.mrb[3].mxu0 }
 0x129   : > { %v2704_v17 = vmul.f32 -1.442695, %v3484_v12  ;;  %v3494_v18 = vadd.f32 %v3478_v8, %v879_v16 }
 0x12a   : > { %3114 = vpow2.f32 %v2706_v14  ;;  %v2707_v19 = vmul.f32 -1.442695, %v3488_v15  ;;  %1104 = vrot.lane.b32.xlu1 %v3488_v15, %s3243_s19 }
 0x12b   : > { %3116 = vpow2.f32 %v2704_v17  ;;  %v2705_v20 = vmul.f32 -1.442695, %v3494_v18 }
 0x12c   : > { %1098 = vrot.lane.b32.xlu0 %v3484_v12, %s3243_s19  ;;  %3118 = vpow2.f32 %v2707_v19  ;;  %v555_v19 = vld [vmem:[%s4137_s29 + $0x58] sm:$0x3f] }
 0x12d   : > { %v2903_v21 = vpop.f32.mrb[4].mxu0  ;;  %3120 = vpow2.f32 %v2705_v20 }
 0x12e   : > { %v3503_v22 = vadd.f32 %v2903_v21, %v3478_v8  ;;  %1100 = vrot.lane.b32.xlu1 %v3494_v18, %s3243_s19  ;;  %v892_v23 = vpop.f32.mrb[5].mxu0  ;;  %v1679_v21 = vld [vmem:[%s4107_s2] sm:$0xff] }
 0x12f   : > { %v3508_v24 = vadd.f32 %v3478_v8, %v892_v23  ;;  %v2904_v25 = vpop.f32.mrb[6].mxu0 }
 0x130   : > { %v2710_v26 = vmul.f32 -1.442695, %v3503_v22  ;;  %v3512_v27 = vadd.f32 %v2904_v25, %v3478_v8  ;;  %1110 = vrot.lane.b32.xlu0 %v3503_v22, %s3243_s19  ;;  %v895_v28 = vpop.f32.mrb[7].mxu0  ;;  %v1681_v25 = vld [vmem:[%s4107_s2 + $0x10] sm:$0xff] }
 0x131   : > { %v2708_v29 = vmul.f32 -1.442695, %v3508_v24  ;;  %v3518_v30 = vadd.f32 %v3478_v8, %v895_v28  ;;  %v1682_v28 = vld [vmem:[%s4107_s2 + $0x18] sm:$0xff] }
 0x132   : > { %3122 = vpow2.f32 %v2710_v26  ;;  %v2711_v31 = vmul.f32 -1.442695, %v3512_v27  ;;  %1112 = vrot.lane.b32.xlu1 %v3512_v27, %s3243_s19  ;;  %v1680_v26 = vld [vmem:[%s4107_s2 + $0x8] sm:$0xff] }
 0x133   : > { %3124 = vpow2.f32 %v2708_v29  ;;  %v2709_v35 = vmul.f32 -1.442695, %v3518_v30  ;;  %v1683_v29 = vld [vmem:[%s4107_s2 + $0x20] sm:$0xff] }
 0x134   : > { %v3115_v32 = vpop.eup %3114  ;;  %1106 = vrot.lane.b32.xlu0 %v3508_v24, %s3243_s19  ;;  %3126 = vpow2.f32 %v2711_v31  ;;  %v1684_v31 = vld [vmem:[%s4107_s2 + $0x28] sm:$0xff] }
 0x135   : > { %v3117_v33 = vpop.eup %3116  ;;  %v992_v34 = vadd.f32 1.0, %v3115_v32  ;;  %v2907_v36 = vpop.f32.mrb[8].mxu0  ;;  %v1685_v32 = vld [vmem:[%s4107_s2 + $0x30] sm:$0xff] }
 0x136   : > { %v990_v37 = vadd.f32 1.0, %v3117_v33  ;;  %v3527_v38 = vadd.f32 %v2907_v36, %v3478_v8  ;;  %1108 = vrot.lane.b32.xlu1 %v3518_v30, %s3243_s19  ;;  %v908_v39 = vpop.f32.mrb[9].mxu0  ;;  %v3119_v40 = vpop.eup %3118  ;;  %v3245_v33 = vmov 0.0   ;;  %v1264_v36 = vld [vmem:[%s4111_s6 + $0x8] sm:$0xff] }
 0x137   : > { %3128 = vrcp.f32 %v992_v34  ;;  %v3532_v41 = vadd.f32 %v3478_v8, %v908_v39  ;;  %v2908_v42 = vpop.f32.mrb[10].mxu0  ;;  %v3121_v46 = vpop.eup %3120  ;;  %v993_v47 = vadd.f32 1.0, %v3119_v40  ;;  %2909 = vmatprep.subr.bf16.mxu1 %v3245_v33  ;;  %v1686_v34 = vld [vmem:[%s4107_s2 + $0x38] sm:$0xff]  ;;  %v1687_v39 = vld [vmem:[%s4107_s2 + $0x40] sm:$0xff]  ;;  %v1688_v40 = vld [vmem:[%s4107_s2 + $0x48] sm:$0xff]  ;;  %2913 = vmatprep.mubr.msk.bf16.mxu1 %vm3246_vm2, %v3245_v33 }
 0x138   : > { %v2714_v43 = vmul.f32 -1.442695, %v3527_v38  ;;  %v911_v44 = vpop.f32.mrb[11].mxu0  ;;  %3130 = vpow2.f32 %v2709_v35  ;;  %v991_v51 = vadd.f32 1.0, %v3121_v46  ;;  %v3542_v53 = vadd.f32 %v2908_v42, %v3478_v8  ;;  %v1263_v35 = vld [vmem:[%s4111_s6] sm:$0xff]  ;;  %v1265_v42 = vld [vmem:[%s4111_s6 + $0x10] sm:$0xff] }
 0x139   : > { %v2712_v45 = vmul.f32 -1.442695, %v3532_v41  ;;  %1114 = vrot.lane.b32.xlu0 %v3532_v41, %s3243_s19  ;;  %3132 = vrcp.f32 %v990_v37  ;;  %v3539_v48 = vadd.f32 %v3478_v8, %v911_v44  ;;  %v1267_v37 = vpack.c.bf16 %v1264_v36, %v1263_v35  ;;  %v1689_v46 = vld [vmem:[%s4107_s2 + $0x50] sm:$0xff] }
 0x13a   : > { %3134 = vpow2.f32 %v2714_v43  ;;  %v2715_v58 = vmul.f32 -1.442695, %v3542_v53  ;;  %v1266_v43 = vld [vmem:[%s4111_s6 + $0x18] sm:$0xff] }
 0x13b   : > { %3136 = vpow2.f32 %v2712_v45  ;;  %v2713_v54 = vmul.f32 -1.442695, %v3539_v48  ;;  %2910 = vmatpush3.bf16.msra.mxu1 %v1267_v37  ;;  %v1268_v44 = vpack.c.bf16 %v1266_v43, %v1265_v42  ;;  %v1161_v45 = vpop.permute.xlu0 %1160 }
 0x13c   : > { %v3123_v49 = vpop.eup %3122  ;;  %3138 = vrcp.f32 %v993_v47  ;;  %2911 = vmatprep.subr.bf16.mxu1 %v3245_v33 }
 0x13d   : > { %v3125_v50 = vpop.eup %3124  ;;  %v996_v52 = vadd.f32 1.0, %v3123_v49 }
 0x13e   : > { %v994_v55 = vadd.f32 1.0, %v3125_v50  ;;  %v3127_v56 = vpop.eup %3126  ;;  %v1181_v50 = vpop.permute.xlu1 %1180 }
 0x13f   : > { %3140 = vrcp.f32 %v996_v52  ;;  %v997_v60 = vadd.f32 1.0, %v3127_v56  ;;  %2912 = vmatpush3.bf16.msra.mxu1 %v1268_v44  ;;  %v1166_v47 = vpop.permute.xlu0 %1165 }
 0x140   : > { %3142 = vrcp.f32 %v991_v51  ;;  %2917 = vmatprep.subr.bf16.mxu1 %v3245_v33 }
 0x141   : > { %v3129_v57 = vpop.eup %3128  ;;  %3144 = vpow2.f32 %v2713_v54 }
 0x142   : > { %1042 = vrot.lane.b32.xlu1 %v3129_v57, %s3244_s30  ;;  %v3131_v59 = vpop.eup %3130  ;;  %3146 = vrcp.f32 %v994_v55  ;;  %v3617_v52 = vpop.permute.xlu1 %1190 }
 0x143   : > { %v3133_v61 = vpop.eup %3132  ;;  %3148 = vpow2.f32 %v2715_v58  ;;  %v995_v1 = vadd.f32 1.0, %v3131_v59  ;;  %v1171_v49 = vpop.permute.xlu0 %1170 }
 0x144   : > { %v3135_v62 = vpop.eup %3134  ;;  %3150 = vrcp.f32 %v997_v60 }
 0x145   : > { %v3137_v63 = vpop.eup %3136  ;;  %v1000_v0 = vadd.f32 1.0, %v3135_v62 }
 0x146   : > { %1038 = vrot.lane.b32.xlu1 %v3133_v61, %s3244_s30  ;;  %v3139_v2 = vpop.eup %3138  ;;  %v998_v3 = vadd.f32 1.0, %v3137_v63  ;;  %v3619_v55 = vpop.permute.xlu1 %1200 }
 0x147   : > { %3152 = vrcp.f32 %v1000_v0  ;;  %v1176_v51 = vpop.permute.xlu0 %1175 }
 0x148   : > { %3154 = vrcp.f32 %v995_v1 }
 0x149   : > { %v3141_v4 = vpop.eup %3140  ;;  %3156 = vrcp.f32 %v998_v3 }
 0x14a   : > { %1044 = vrot.lane.b32.xlu1 %v3139_v2, %s3244_s30  ;;  %1050 = vrot.lane.b32.xlu0 %v3141_v4, %s3244_s30  ;;  %v3143_v5 = vpop.eup %3142  ;;  %v3623_v57 = vpop.permute.xlu1 %1210 }
 0x14b   : > { %v3145_v6 = vpop.eup %3144  ;;  %v1186_v54 = vpop.permute.xlu0 %1185 }
 0x14c   : > { %v3147_v7 = vpop.eup %3146  ;;  %v999_v8 = vadd.f32 1.0, %v3145_v6 }
 0x14d   : > { %v3149_v9 = vpop.eup %3148 }
 0x14e   : > { %1040 = vrot.lane.b32.xlu1 %v3143_v5, %s3244_s30  ;;  %1046 = vrot.lane.b32.xlu0 %v3147_v7, %s3244_s30  ;;  %v3151_v11 = vpop.eup %3150  ;;  %v1001_v14 = vadd.f32 1.0, %v3149_v9  ;;  %3158 = vrcp.f32 %v999_v8 }
 0x14f   : > { %v3621_v56 = vpop.permute.xlu0 %1195 }
 0x150   : > { %3160 = vrcp.f32 %v1001_v14 }
 0x151   : > { %v3153_v13 = vpop.eup %3152 }
 0x152   : > { %1052 = vrot.lane.b32.xlu1 %v3151_v11, %s3244_s30  ;;  %1058 = vrot.lane.b32.xlu0 %v3153_v13, %s3244_s30  ;;  %v3155_v16 = vpop.eup %3154 }
 0x153   : > { %v3157_v17 = vpop.eup %3156  ;;  %v3625_v58 = vpop.permute.xlu0 %1205 }
 0x156   : > { %1048 = vrot.lane.b32.xlu1 %v3155_v16, %s3244_s30  ;;  %1054 = vrot.lane.b32.xlu0 %v3157_v17, %s3244_s30 }
 0x158   : > { %v3159_v20 = vpop.eup %3158 }
 0x15a   : > { %1116 = vrot.lane.b32.xlu1 %v3539_v48, %s3243_s19  ;;  %1215 = vperm.xlu0 %3101, %v555_v19   ;;  %v3161_v23 = vpop.eup %3160 }
 0x15e   : > { %1056 = vrot.lane.b32.xlu1 %v3159_v20, %s3244_s30  ;;  %1118 = vrot.lane.b32.xlu0 %v3527_v38, %s3243_s19 }
 0x162   : > { %1060 = vrot.lane.b32.xlu1 %v3161_v23, %s3244_s30  ;;  %2312 = vperm.xlu0 %3101, %v1679_v21  }
 0x166   : > { %1120 = vrot.lane.b32.xlu1 %v3542_v53, %s3243_s19  ;;  %2322 = vperm.xlu0 %3101, %v1681_v25  }
 0x16a   : > { %2317 = vperm.xlu1 %3102, %v1680_v26   ;;  %2327 = vperm.xlu0 %3101, %v1682_v28  }
 0x16e   : > { %2332 = vperm.xlu1 %3102, %v1683_v29   ;;  %2337 = vperm.xlu0 %3101, %v1684_v31  }
 0x172   : > { %2342 = vperm.xlu1 %3102, %v1685_v32   ;;  %2347 = vperm.xlu0 %3101, %v1686_v34  }
 0x176   : > { %2352 = vperm.xlu1 %3102, %v1687_v39   ;;  %2357 = vperm.xlu0 %3101, %v1688_v40  }
 0x17a   : > { %2362 = vperm.xlu1 %3102, %v1689_v46  }
 0x19a   : > { %v1103_v60 = vpop.permute.xlu0 %1102 }
 0x19c   : > { %v1105_v59 = vpop.permute.xlu1 %1104 }
 0x19e   : > { %v1099_v62 = vpop.permute.xlu0 %1098 }
 0x1a0   : > { %v1101_v61 = vpop.permute.xlu1 %1100 }
 0x1a2   : > { %v1111_v0 = vpop.permute.xlu0 %1110 }
 0x1a4   : > { %v1113_v63 = vpop.permute.xlu1 %1112 }
 0x1a6   : > { %v1107_v2 = vpop.permute.xlu0 %1106 }
 0x1a8   : > { %v1109_v1 = vpop.permute.xlu1 %1108 }
 0x1ab   : > { %v1115_v4 = vpop.permute.xlu0 %1114 }
 0x1b4   : > { %v1043_v3 = vpop.permute.xlu1 %1042 }
 0x1b5   : > { %v1076_v7 = vadd.f32 %v1043_v3, %v3481_v10 }
 0x1b7   : > { %v3632_v14 = vadd.f32 %v1103_v60, %v1076_v7 }
 0x1b8   : > { %v1039_v5 = vpop.permute.xlu1 %1038 }
 0x1b9   : > { %v1074_v6 = vadd.f32 %v1039_v5, %v3484_v12  ;;  %v1148_v10 = vmax.f32 %v3632_v14, 0.0 }
 0x1bb   : > { %v3629_v11 = vadd.f32 %v1099_v62, %v1074_v6 }
 0x1bc   : > { %v1045_v8 = vpop.permute.xlu1 %1044  ;;  %v1051_v9 = vpop.permute.xlu0 %1050 }
 0x1bd   : > { %v1077_v13 = vadd.f32 %v1045_v8, %v3488_v15  ;;  %v1146_v19 = vmax.f32 %v3629_v11, 0.0  ;;  %v1080_v31 = vadd.f32 %v1051_v9, %v3503_v22 }
 0x1bf   : > { %v3635_v20 = vadd.f32 %v1105_v59, %v1077_v13  ;;  %v1218_v15 = vmul.f32 %v1161_v45, %v1146_v19  ;;  %v3659_v40 = vadd.f32 %v1111_v0, %v1080_v31 }
 0x1c0   : > { %v1041_v16 = vpop.permute.xlu1 %1040  ;;  %v1047_v17 = vpop.permute.xlu0 %1046 }
 0x1c1   : > { %v1075_v21 = vadd.f32 %v1041_v16, %v3494_v18  ;;  %v1078_v12 = vadd.f32 %v1047_v17, %v3508_v24  ;;  %v1149_v28 = vmax.f32 %v3635_v20, 0.0  ;;  %v1220_v18 = vmul.f32 %v1171_v49, %v1148_v10 }
 0x1c2   : > { %v1231_v36 = vsel %vm1230_vm3, %v1218_v15, 0.0 }
 0x1c3   : > { %v3640_v23 = vadd.f32 %v1101_v61, %v1075_v21  ;;  %v3642_v25 = vadd.f32 %v1107_v2, %v1078_v12  ;;  %v1221_v37 = vmul.f32 %v1176_v51, %v1149_v28  ;;  %v1234_v43 = vsel %vm1230_vm3, %v1220_v18, 0.0 }
 0x1c4   : > { %v1053_v26 = vpop.permute.xlu1 %1052  ;;  %v1059_v32 = vpop.permute.xlu0 %1058 }
 0x1c5   : > { %v1147_v29 = vmax.f32 %v3640_v23, 0.0  ;;  %v1150_v34 = vmax.f32 %v3642_v25, 0.0  ;;  %v1081_v45 = vadd.f32 %v1053_v26, %v3512_v27  ;;  %v1236_v51 = vsel %vm1230_vm3, %v1221_v37, 0.0 }
 0x1c7   : > { %v1219_v24 = vmul.f32 %v1166_v47, %v1147_v29  ;;  %v1222_v44 = vmul.f32 %v1181_v50, %v1150_v34  ;;  %v3671_v0 = vadd.f32 %v1113_v63, %v1081_v45 }
 0x1c8   : > { %v1049_v35 = vpop.permute.xlu1 %1048  ;;  %v1055_v49 = vpop.permute.xlu0 %1054 }
 0x1c9   : > { %v1232_v39 = vsel %vm1230_vm3, %v1219_v24, 0.0  ;;  %v1079_v22 = vadd.f32 %v1049_v35, %v3518_v30  ;;  %v1152_v30 = vmax.f32 %v3659_v40, 0.0  ;;  %v1238_v62 = vsel %vm1230_vm3, %v1222_v44, 0.0  ;;  %v3105_v40 = vld [vmem:[%s4108_s3] sm:$0xff]  }
 0x1ca   : > { %v1233_v42 = vadd.f32 %v1232_v39, %v1231_v36  ;;  %v1082_v27 = vadd.f32 %v1055_v49, %v3532_v41  ;;  %v1153_v7 = vmax.f32 %v3671_v0, 0.0  ;;  %2951 = vmatprep.mubr.msk.bf16.mxu0 %vm1557_vm7, %v3105_v40 }
 0x1cb   : > { %v3665_v46 = vadd.f32 %v1109_v1, %v1079_v22  ;;  %v1224_v6 = vmul.f32 %v3617_v52, %v1152_v30 }
 0x1cc   : > { %v1235_v47 = vadd.f32 %v1234_v43, %v1233_v42  ;;  %v1117_v59 = vpop.permute.xlu1 %1116  ;;  %v3682_v8 = vadd.f32 %v1115_v4, %v1082_v27 }
 0x1cd   : > { %v1151_v60 = vmax.f32 %v3665_v46, 0.0  ;;  %v1242_v41 = vsel %vm1230_vm3, %v1224_v6, 0.0  ;;  %v3111_v46 = vld [vmem:[%s4116_s11 + $0x8] sm:$0xff]  }
 0x1ce   : > { %v1237_v61 = vadd.f32 %v1236_v51, %v1235_v47 }
 0x1cf   : > { %v1223_v50 = vmul.f32 %v1186_v54, %v1151_v60  ;;  %v1225_v54 = vmul.f32 %v3621_v56, %v1153_v7  ;;  %v1084_v56 = vadd.f32 %v1059_v32, %v3527_v38 }
 0x1d0   : > { %v1239_v1 = vadd.f32 %v1238_v62, %v1237_v61  ;;  %v1057_v2 = vpop.permute.xlu1 %1056 }
 0x1d1   : > { %v1240_v3 = vsel %vm1230_vm3, %v1223_v50, 0.0  ;;  %v1083_v5 = vadd.f32 %v1057_v2, %v3539_v48  ;;  %v1154_v48 = vmax.f32 %v3682_v8, 0.0  ;;  %v1244_v12 = vsel %vm1230_vm3, %v1225_v54, 0.0  ;;  %v1269_v2 = vld [vmem:[%s4112_s7] sm:$0x1] }
 0x1d2   : > { %v1241_v63 = vadd.f32 %v1240_v3, %v1239_v1 }
 0x1d3   : > { %v3684_v13 = vadd.f32 %v1117_v59, %v1083_v5  ;;  %v1226_v26 = vmul.f32 %v3619_v55, %v1154_v48 }
 0x1d4   : > { %v1061_v9 = vpop.permute.xlu1 %1060  ;;  %v1243_v16 = vadd.f32 %v1242_v41, %v1241_v63 }
 0x1d5   : > { %v1155_v52 = vmax.f32 %v3684_v13, 0.0  ;;  %v1085_v21 = vadd.f32 %v1061_v9, %v3542_v53  ;;  %v1246_v35 = vsel %vm1230_vm3, %v1226_v26, 0.0 }
 0x1d6   : > { %v1245_v31 = vadd.f32 %v1244_v12, %v1243_v16  ;;  %v3103_v16 = vld [vmem:[%s4115_s10] sm:$0xff]  }
 0x1d7   : > { %v1227_v18 = vmul.f32 %v3625_v58, %v1155_v52 }
 0x1d8   : > { %v1121_v17 = vpop.permute.xlu1 %1120  ;;  %v1247_v37 = vadd.f32 %v1246_v35, %v1245_v31 }
 0x1d9   : > { %v1216_v4 = vpop.permute.xlu0 %1215  ;;  %v3697_v15 = vadd.f32 %v1121_v17, %v1085_v21  ;;  %v1248_v39 = vsel %vm1230_vm3, %v1227_v18, 0.0  ;;  %v3104_v17 = vld [vmem:[%s4115_s10 + $0x8] sm:$0xff]   ;;  %v1317_v21 = vld [vmem:[%s4114_s9] sm:$0x1] }
 0x1da   : > { %v1249_v58 = vadd.f32 %v1248_v39, %v1247_v37  ;;  %v1372_v37 = vlaneseq }
 0x1db   : > { %v1157_v53 = vmax.f32 %v3697_v15, 0.0 }
 0x1dc   : > { %v3736_v39 = vshrl.u32 %v1372_v37, 7 }
 0x1dd   : > { %v1119_v24 = vpop.permute.xlu0 %1118  ;;  %v1229_v22 = vmul.f32 %v1216_v4, %v1157_v53 }
 0x1de   : > { %v3705_v36 = vadd.f32 %v1119_v24, %v1084_v56 }
 0x1df   : > { %v1253_v43 = vsel %vm1252_vm4, %v1229_v22, 0.0  ;;  %v1374_v22 = vsub.s32 0, %v3736_v39 }
 0x1e0   : > { %v1156_v55 = vmax.f32 %v3705_v36, 0.0 }
 0x1e2   : > { %v1228_v38 = vmul.f32 %v3623_v57, %v1156_v55  ;;  %v1315_v57 = vld [vmem:[%s4113_s8] sm:$0x3] }
 0x1e3   : > { %v1316_v27 = vpack.c.bf16 %v1315_v57, %v1315_v57 }
 0x1e4   : > { %v1250_v32 = vsel %vm1230_vm3, %v1228_v38, 0.0 }
 0x1e5   : > { %v1251_v42 = vadd.f32 %v1250_v32, %v1249_v58  ;;  %v1324_v1 = vsel %vm1322_vm5, %v1316_v27, 0 }
 0x1e7   : > { %v1254_v44 = vadd.f32 %v1253_v43, %v1251_v42 }
 0x1e9   : > { %v1255_v45 = vrot.slane %v1254_v44, 4 }
 0x1eb   : > { %v1256_v47 = vadd.f32 %v1255_v45, %v1254_v44 }
 0x1ed   : > { %v1257_v49 = vrot.slane %v1256_v47, 2 }
 0x1ef   : > { %v1258_v59 = vadd.f32 %v1257_v49, %v1256_v47 }
 0x1f1   : > { %v1259_v51 = vrot.slane %v1258_v59, 1 }
 0x1f3   : > { %v1260_v61 = vadd.f32 %v1259_v51, %v1258_v59 }
 0x1f5   : > { %v1261_v62 = vmul.f32 0.0125, %v1260_v61 }
 0x1f7   : > { %v1262_v50 = vpack.c.bf16 %v1261_v62, %v1261_v62 }
 0x1f9   : > { %2914 = vmatmul.mubr.msk.bf16.vlgmr.msra.gmra.mrb[0].mxu1 %vm1230_vm3, %v1262_v50 }
 0x1fa   : > { %2919 = vmatprep.mubr.msk.bf16.mxu1 %vm3246_vm2, %v3245_v33  ;;  %2918 = vmatpush3.bf16.msra.mxu1 %v1324_v1 }
 0x1fb   : > { %2923 = vmatprep.subr.bf16.mxu1 %v3103_v16 }
 0x2cc   : > { %v1307_v3 = vpop.f32.mrb[0].mxu1 }
 0x2cd   : > { %v1308_v5 = vadd.f32 %v1307_v3, %v1269_v2  ;;  %v2915_v6 = vpop.f32.mrb[1].mxu1  ;;  %v3106_v2 = vld [vmem:[%s4108_s3 + $0x8] sm:$0xff]   ;;  %v3107_v3 = vld [vmem:[%s4108_s3 + $0x10] sm:$0xff]  }
 0x2ce   : > { %v1310_v63 = vpop.f32.mrb[2].mxu1  ;;  %v3109_v6 = vld [vmem:[%s4108_s3 + $0x20] sm:$0xff]  }
 0x2cf   : > { %v1313_v9 = vmax.f32 %v1308_v5, 0.0  ;;  %v2916_v41 = vpop.f32.mrb[3].mxu1  ;;  %v3108_v5 = vld [vmem:[%s4108_s3 + $0x18] sm:$0xff]   ;;  %v3110_v63 = vld [vmem:[%s4108_s3 + $0x28] sm:$0xff]  }
 0x2d1   : > { %v1314_v54 = vpack.c.bf16 %v1313_v9, %v1313_v9  ;;  %v3112_v9 = vld [vmem:[%s4116_s11] sm:$0xff]  }
 0x2d3   : > { %2920 = vmatmul.mubr.msk.bf16.vlgmr.msra.gmra.mrb[4].mxu1 %vm1318_vm6, %v1314_v54 }
 0x2d4   : > { %2924 = vmatpush3.bf16.msra.mxu1 %v3103_v16 }
 0x2d5   : > { %2925 = vmatprep.subr.bf16.mxu1 %v3104_v17 }
 0x2d8   : > { %2926 = vmatpush3.bf16.msra.mxu1 %v3104_v17 }
 0x2d9   : > { %2963 = vmatprep.subr.bf16.mxu1 %v3111_v46 }
 0x3a6   : > { %v1360_v4 = vpop.f32.mrb[4].mxu1 }
 0x3a7   : > { %v1361_v12 = vadd.f32 %v1360_v4, %v1317_v21  ;;  %v2921_v26 = vpop.f32.mrb[5].mxu1 }
 0x3a8   : > { %v1363_v31 = vpop.f32.mrb[6].mxu1 }
 0x3a9   : > { %v2718_v56 = vmul.f32 -1.442695, %v1361_v12  ;;  %v2922_v18 = vpop.f32.mrb[7].mxu1 }
 0x3ab   : > { %3162 = vpow2.f32 %v2718_v56 }
 0x3b5   : > { %v3163_v24 = vpop.eup %3162 }
 0x3b6   : > { %v1369_v35 = vadd.f32 1.0, %v3163_v24 }
 0x3b8   : > { %3164 = vrcp.f32 %v1369_v35 }
 0x3c2   : > { %v3165_v38 = vpop.eup %3164 }
 0x3c3   : > { %v1375_v58 = vrot.slane %v3165_v38, %v1374_v22 }
 0x3c5   : > { %v1376_v32 = vmul.f32 %v1375_v58, %v1146_v19  ;;  %v1377_v42 = vmul.f32 %v1375_v58, %v1147_v29  ;;  %v1378_v43 = vmul.f32 %v1375_v58, %v1148_v10  ;;  %v1379_v44 = vmul.f32 %v1375_v58, %v1149_v28 }
 0x3c6   : > { %v1380_v45 = vmul.f32 %v1375_v58, %v1150_v34  ;;  %v1381_v47 = vmul.f32 %v1375_v58, %v1151_v60  ;;  %v1382_v14 = vmul.f32 %v1375_v58, %v1152_v30  ;;  %v1383_v19 = vmul.f32 %v1375_v58, %v1153_v7 }
 0x3c7   : > { %v1388_v49 = vpack.c.bf16 %v1377_v42, %v1376_v32  ;;  %v1389_v59 = vpack.c.bf16 %v1379_v44, %v1378_v43  ;;  %v1384_v20 = vmul.f32 %v1375_v58, %v1154_v48  ;;  %v1385_v10 = vmul.f32 %v1375_v58, %v1155_v52 }
 0x3c8   : > { %v1390_v11 = vpack.c.bf16 %v1381_v47, %v1380_v45  ;;  %v1391_v23 = vpack.c.bf16 %v1383_v19, %v1382_v14  ;;  %v1386_v28 = vmul.f32 %v1375_v58, %v1156_v55  ;;  %v1387_v29 = vmul.f32 %v1375_v58, %v1157_v53 }
 0x3c9   : > { %2927 = vmatprep.mubr.msk.bf16.mxu1 %vm1230_vm3, %v1388_v49  ;;  %v1392_v25 = vpack.c.bf16 %v1385_v10, %v1384_v20 }
 0x3ca   : > { %2928 = vmatmul.mubr.msk.bf16.vlgmr.msra.gmra.mrb[8].mxu1 %vm1230_vm3, %v1389_v59  ;;  %v1393_v34 = vpack.c.bf16 %v1387_v29, %v1386_v28 }
 0x3cb   : > { %2931 = vmatprep.mubr.msk.bf16.mxu1 %vm1230_vm3, %v1390_v11  ;;  %2964 = vmatpush3.bf16.msra.mxu1 %v3111_v46 }
 0x3cc   : > { %2977 = vmatprep.subr.bf16.mxu1 %v3112_v9 }
 0x3d2   : > { %2932 = vmatmul.mubr.msk.bf16.gmra.mrb[12].mxu1 %vm1230_vm3, %v1391_v23 }
 0x3d3   : > { %2935 = vmatprep.mubr.msk.bf16.mxu1 %vm1230_vm3, %v1392_v25 }
 0x3da   : > { %2936 = vmatmul.mubr.msk.bf16.gmra.mrb[16].mxu1 %vm1230_vm3, %v1393_v34 }
 0x49d   : > { %v2929_v60 = vpop.f32.mrb[8].mxu1 }
 0x49e   : > { %v1462_v30 = vpop.f32.mrb[9].mxu1 }
 0x49f   : > { %v2930_v0 = vpop.f32.mrb[10].mxu1 }
 0x4a0   : > { %v1522_v7 = vpack.c.bf16 %v2930_v0, %v2929_v60  ;;  %v1465_v8 = vpop.f32.mrb[11].mxu1 }
 0x4a1   : > { %v1521_v13 = vpack.c.bf16 %v1465_v8, %v1462_v30 }
 0x4a3   : > { %2939 = vmatprep.subr.bf16.mxu0 %v1521_v13 }
 0x4a4   : > { %2940 = vmatpush3.bf16.msra.mxu0 %v1521_v13 }
 0x4a5   : > { %v2933_v48 = vpop.f32.mrb[12].mxu1  ;;  %2941 = vmatprep.subr.bf16.mxu0 %v1522_v7 }
 0x4a6   : > { %v1478_v52 = vpop.f32.mrb[13].mxu1 }
 0x4a7   : > { %v2934_v15 = vpop.f32.mrb[14].mxu1 }
 0x4a8   : > { %v1524_v53 = vpack.c.bf16 %v2934_v15, %v2933_v48  ;;  %v1481_v36 = vpop.f32.mrb[15].mxu1  ;;  %2942 = vmatpush3.bf16.msra.mxu0 %v1522_v7 }
 0x4a9   : > { %v1523_v55 = vpack.c.bf16 %v1481_v36, %v1478_v52 }
 0x4ab   : > { %2943 = vmatprep.subr.bf16.mxu0 %v1523_v55 }
 0x4ac   : > { %2944 = vmatpush3.bf16.msra.mxu0 %v1523_v55  ;;  %v3113_v55 = vld [vmem:[%s4116_s11 + $0x10] sm:$0xff]  }
 0x4ad   : > { %v2937_v51 = vpop.f32.mrb[16].mxu1  ;;  %2945 = vmatprep.subr.bf16.mxu0 %v1524_v53 }
 0x4ae   : > { %v1494_v61 = vpop.f32.mrb[17].mxu1 }
 0x4af   : > { %v2938_v62 = vpop.f32.mrb[18].mxu1 }
 0x4b0   : > { %v1526_v50 = vpack.c.bf16 %v2938_v62, %v2937_v51  ;;  %v1497_v57 = vpop.f32.mrb[19].mxu1  ;;  %2946 = vmatpush3.bf16.msra.mxu0 %v1524_v53 }
 0x4b1   : > { %v1525_v27 = vpack.c.bf16 %v1497_v57, %v1494_v61 }
 0x4b2   : > { %v1578_v1 = vsel %vm1576_vm8, %v1526_v50, 0 }
 0x4b3   : > { %2947 = vmatprep.subr.bf16.mxu0 %v1525_v27 }
 0x4b4   : > { %2948 = vmatpush3.bf16.msra.mxu0 %v1525_v27 }
 0x4b5   : > { %3070 = vmatprep.subr.msk.bf16.mxu0 %vm1576_vm8, %v1526_v50 }
 0x4b8   : > { %2950 = vmatpush3.bf16.msra.mxu0 %v1578_v1 }
 0x4b9   : > { %3005 = vmatprep.subr.bf16.mxu0 %v3245_v33 }
 0x4bb   : > { %2952 = vmatmul.mubr.msk.bf16.vlgmr.msra.gmra.mrb[12].mxu0 %vm1557_vm7, %v3106_v2 }
 0x4bc   : > { %2955 = vmatprep.mubr.msk.bf16.mxu0 %vm1557_vm7, %v3107_v3 }
 0x4c3   : > { %2956 = vmatmul.mubr.msk.bf16.gmra.mrb[16].mxu0 %vm1557_vm7, %v3108_v5 }
 0x4c4   : > { %2959 = vmatprep.mubr.msk.bf16.mxu0 %vm1557_vm7, %v3109_v6 }
 0x4cb   : > { %2960 = vmatmul.mubr.msk.bf16.gmra.mrb[20].mxu0 %vm1557_vm7, %v3110_v63 }
 0x4cc   : > { %3009 = vmatprep.mubr.msk.bf16.mxu0 %vm3246_vm2, %v3245_v33 }
 0x58e   : > { %v2953_v41 = vpop.f32.mrb[12].mxu0 }
 0x58f   : > { %v1614_v54 = vpop.f32.mrb[13].mxu0  ;;  %v1663_v17 = vmax.f32 %v2953_v41, 0.0 }
 0x590   : > { %v2954_v16 = vpop.f32.mrb[14].mxu0  ;;  %v1661_v12 = vmax.f32 %v1614_v54, 0.0 }
 0x591   : > { %v1664_v21 = vmax.f32 %v2954_v16, 0.0  ;;  %v1617_v4 = vpop.f32.mrb[15].mxu0 }
 0x592   : > { %v1662_v26 = vmax.f32 %v1617_v4, 0.0 }
 0x593   : > { %v3806_v31 = vpack.c.bf16 %v1664_v21, %v1663_v17 }
 0x594   : > { %v3808_v56 = vpack.c.bf16 %v1662_v26, %v1661_v12 }
 0x595   : > { %v1960_v18 = vrot.slane %v3806_v31, 1  ;;  %v1705_v37 = vshll.u32 %v3806_v31, 16  ;;  %v1709_v25 = vshrl.u32 %v3806_v31, 16 }
 0x596   : > { %v2957_v24 = vpop.f32.mrb[16].mxu0  ;;  %v1700_v35 = vshll.u32 %v3808_v56, 16  ;;  %v1959_v38 = vrot.slane %v3808_v56, 1  ;;  %v1698_v42 = vshrl.u32 %v3808_v56, 16 }
 0x597   : > { %v1630_v58 = vpop.f32.mrb[17].mxu0  ;;  %v1667_v45 = vmax.f32 %v2957_v24, 0.0  ;;  %v1707_v19 = vrot.slane %v1705_v37, 1 }
 0x598   : > { %v2958_v32 = vpop.f32.mrb[18].mxu0  ;;  %v1702_v43 = vrot.slane %v1700_v35, 1  ;;  %v3816_v44 = vsel %vm1576_vm8, %v1959_v38, %v1960_v18  ;;  %v1665_v59 = vmax.f32 %v1630_v58, 0.0 }
 0x599   : > { %v1668_v47 = vmax.f32 %v2958_v32, 0.0  ;;  %v1633_v49 = vpop.f32.mrb[19].mxu0  ;;  %v1711_v60 = vor.u32 %v1709_v25, %v1707_v19 }
 0x59a   : > { %v1666_v11 = vmax.f32 %v1633_v49, 0.0  ;;  %v1703_v14 = vor.u32 %v1702_v43, %v1698_v42 }
 0x59b   : > { %v1676_v20 = vpack.c.bf16 %v1668_v47, %v1667_v45 }
 0x59c   : > { %v1675_v10 = vpack.c.bf16 %v1666_v11, %v1665_v59  ;;  %v1708_v23 = vsel %vm1696_vm9, %v1703_v14, %v1707_v19 }
 0x59d   : > { %2965 = vmatprep.mubr.msk.bf16.mxu1 %vm1750_vm10, %v1708_v23  ;;  %v1721_v28 = vshll.u32 %v1676_v20, 16  ;;  %v1964_v29 = vrot.slane %v1676_v20, 1  ;;  %v1725_v2 = vshrl.u32 %v1676_v20, 16 }
 0x59e   : > { %v1713_v34 = vshll.u32 %v1675_v10, 16  ;;  %v1962_v40 = vrot.slane %v1675_v10, 1  ;;  %v2961_v46 = vpop.f32.mrb[20].mxu0  ;;  %v1717_v8 = vshrl.u32 %v1675_v10, 16 }
 0x59f   : > { %v1646_v30 = vpop.f32.mrb[21].mxu0  ;;  %v1671_v52 = vmax.f32 %v2961_v46, 0.0  ;;  %v1723_v36 = vrot.slane %v1721_v28, 1 }
 0x5a0   : > { %v1715_v0 = vrot.slane %v1713_v34, 1  ;;  %v2962_v7 = vpop.f32.mrb[22].mxu0  ;;  %v1963_v13 = vsel %vm1576_vm8, %v1960_v18, %v1962_v40  ;;  %v1965_v48 = vsel %vm1576_vm8, %v1962_v40, %v1964_v29  ;;  %v1669_v51 = vmax.f32 %v1646_v30, 0.0 }
 0x5a1   : > { %v1672_v15 = vmax.f32 %v2962_v7, 0.0  ;;  %v1649_v53 = vpop.f32.mrb[23].mxu0  ;;  %v1727_v41 = vor.u32 %v1725_v2, %v1723_v36 }
 0x5a2   : > { %v1670_v61 = vmax.f32 %v1649_v53, 0.0  ;;  %v1716_v62 = vsel %vm1696_vm9, %v1711_v60, %v1715_v0  ;;  %v1719_v50 = vor.u32 %v1717_v8, %v1715_v0 }
 0x5a3   : > { %v1678_v57 = vpack.c.bf16 %v1672_v15, %v1671_v52  ;;  %2966 = vmatmul.mubr.msk.bf16.vlgmr.msra.gmra.mrb[20].mxu1 %vm1750_vm10, %v1716_v62 }
 0x5a4   : > { %v1677_v27 = vpack.c.bf16 %v1670_v61, %v1669_v51  ;;  %2978 = vmatpush3.bf16.msra.mxu1 %v3112_v9  ;;  %v1724_v1 = vsel %vm1696_vm9, %v1719_v50, %v1723_v36 }
 0x5a5   : > { %2969 = vmatprep.mubr.msk.bf16.mxu1 %vm1750_vm10, %v1724_v1  ;;  %2991 = vmatprep.subr.bf16.mxu1 %v3113_v55  ;;  %v1968_v3 = vrot.slane %v1678_v57, 1  ;;  %v1737_v6 = vshll.u32 %v1678_v57, 16  ;;  %v1741_v18 = vshrl.u32 %v1678_v57, 16 }
 0x5a6   : > { %v1729_v5 = vshll.u32 %v1677_v27, 16  ;;  %v1966_v63 = vrot.slane %v1677_v27, 1  ;;  %v1733_v16 = vshrl.u32 %v1677_v27, 16 }
 0x5a7   : > { %v1739_v12 = vrot.slane %v1737_v6, 1 }
 0x5a8   : > { %v1731_v54 = vrot.slane %v1729_v5, 1  ;;  %v1967_v17 = vsel %vm1576_vm8, %v1964_v29, %v1966_v63  ;;  %v1969_v21 = vsel %vm1576_vm8, %v1966_v63, %v1968_v3 }
 0x5a9   : > { %v1743_v24 = vor.u32 %v1741_v18, %v1739_v12 }
 0x5aa   : > { %v1732_v4 = vsel %vm1696_vm9, %v1727_v41, %v1731_v54  ;;  %v1735_v9 = vor.u32 %v1733_v16, %v1731_v54 }
 0x5ab   : > { %2970 = vmatmul.mubr.msk.bf16.gmra.mrb[24].mxu1 %vm1750_vm10, %v1732_v4 }
 0x5ac   : > { %v1740_v26 = vsel %vm1696_vm9, %v1735_v9, %v1739_v12 }
 0x5ad   : > { %2973 = vmatprep.mubr.msk.bf16.mxu1 %vm1750_vm10, %v1740_v26 }
 0x5b3   : > { %2974 = vmatmul.mubr.msk.bf16.gmra.mrb[28].mxu1 %vm1750_vm10, %v1743_v24 }
 0x5b4   : > { %2979 = vmatprep.mubr.msk.bf16.mxu1 %vm1750_vm10, %v3808_v56 }
 0x5bb   : > { %2980 = vmatmul.mubr.msk.bf16.vlgmr.msra.gmra.mrb[20].mxu1 %vm1750_vm10, %v3806_v31  ;;  %v2764_v31 = vld [vmem:[%s4117_s12] ss:$0 sm:$0xff] }
 0x5bc   : > { %2983 = vmatprep.mubr.msk.bf16.mxu1 %vm1750_vm10, %v1675_v10  ;;  %2992 = vmatpush3.bf16.msra.mxu1 %v3113_v55 }
 0x5c3   : > { %2984 = vmatmul.mubr.msk.bf16.gmra.mrb[24].mxu1 %vm1750_vm10, %v1676_v20 }
 0x5c4   : > { %2987 = vmatprep.mubr.msk.bf16.mxu1 %vm1750_vm10, %v1677_v27 }
 0x5cb   : > { %2988 = vmatmul.mubr.msk.bf16.gmra.mrb[28].mxu1 %vm1750_vm10, %v1678_v57 }
 0x5cc   : > { %2993 = vmatprep.mubr.msk.bf16.mxu1 %vm1750_vm10, %v3816_v44 }
 0x5d3   : > { %2994 = vmatmul.mubr.msk.bf16.vlgmr.msra.gmra.mrb[20].mxu1 %vm1750_vm10, %v1963_v13 }
 0x5d4   : > { %2997 = vmatprep.mubr.msk.bf16.mxu1 %vm1750_vm10, %v1965_v48 }
 0x5db   : > { %2998 = vmatmul.mubr.msk.bf16.gmra.mrb[24].mxu1 %vm1750_vm10, %v1967_v17 }
 0x5dc   : > { %3001 = vmatprep.mubr.msk.bf16.mxu1 %vm1750_vm10, %v1969_v21 }
 0x5e3   : > { %3002 = vmatmul.mubr.msk.bf16.gmra.mrb[28].mxu1 %vm1750_vm10, %v1968_v3 }
 0x6a6   : > { %v2995_v56 = vpop.f32.mrb[20].mxu1 }
 0x6a7   : > { %v3855_v35 = vadd.f32 %v2995_v56, %v2764_v31  ;;  %v2028_v37 = vpop.f32.mrb[21].mxu1 }
 0x6a8   : > { %v3857_v38 = vadd.f32 %v2764_v31, %v2028_v37  ;;  %v2996_v58 = vpop.f32.mrb[22].mxu1 }
 0x6a9   : > { %v2767_v32 = vmul.f32 -1.442695, %v3855_v35  ;;  %v3860_v42 = vadd.f32 %v2996_v58, %v2764_v31  ;;  %2254 = vrot.lane.b32.xlu0 %v3855_v35, %s3243_s19  ;;  %v2031_v43 = vpop.f32.mrb[23].mxu1 }
 0x6aa   : > { %v2765_v44 = vmul.f32 -1.442695, %v3857_v38  ;;  %v3865_v45 = vadd.f32 %v2764_v31, %v2031_v43 }
 0x6ab   : > { %3166 = vpow2.f32 %v2767_v32  ;;  %v2768_v47 = vmul.f32 -1.442695, %v3860_v42  ;;  %2256 = vrot.lane.b32.xlu1 %v3860_v42, %s3243_s19 }
 0x6ac   : > { %3168 = vpow2.f32 %v2765_v44  ;;  %v2766_v49 = vmul.f32 -1.442695, %v3865_v45 }
 0x6ad   : > { %3170 = vpow2.f32 %v2768_v47  ;;  %2250 = vrot.lane.b32.xlu0 %v3857_v38, %s3243_s19 }
 0x6ae   : > { %3172 = vpow2.f32 %v2766_v49  ;;  %v2999_v59 = vpop.f32.mrb[24].mxu1 }
 0x6af   : > { %v3873_v11 = vadd.f32 %v2999_v59, %v2764_v31  ;;  %2252 = vrot.lane.b32.xlu1 %v3865_v45, %s3243_s19  ;;  %v2044_v14 = vpop.f32.mrb[25].mxu1 }
 0x6b0   : > { %v3877_v19 = vadd.f32 %v2764_v31, %v2044_v14  ;;  %v3000_v20 = vpop.f32.mrb[26].mxu1  ;;  %v1690_v14 = vld [vmem:[%s4107_s2 + $0x58] sm:$0x3f] }
 0x6b1   : > { %v2771_v10 = vmul.f32 -1.442695, %v3873_v11  ;;  %v3880_v23 = vadd.f32 %v3000_v20, %v2764_v31  ;;  %2262 = vrot.lane.b32.xlu0 %v3873_v11, %s3243_s19  ;;  %v2047_v25 = vpop.f32.mrb[27].mxu1 }
 0x6b2   : > { %v2769_v28 = vmul.f32 -1.442695, %v3877_v19  ;;  %v3885_v29 = vadd.f32 %v2764_v31, %v2047_v25  ;;  %v2413_v25 = vld [vmem:[%s4118_s13] sm:$0xff] }
 0x6b3   : > { %3174 = vpow2.f32 %v2771_v10  ;;  %v2772_v34 = vmul.f32 -1.442695, %v3880_v23  ;;  %2264 = vrot.lane.b32.xlu1 %v3880_v23, %s3243_s19 }
 0x6b4   : > { %3176 = vpow2.f32 %v2769_v28  ;;  %v2770_v40 = vmul.f32 -1.442695, %v3885_v29  ;;  %v2414_v28 = vld [vmem:[%s4118_s13 + $0x8] sm:$0xff] }
 0x6b5   : > { %v3167_v46 = vpop.eup %3166  ;;  %3178 = vpow2.f32 %v2772_v34  ;;  %2258 = vrot.lane.b32.xlu0 %v3877_v19, %s3243_s19  ;;  %v2417_v34 = vpack.c.bf16 %v2414_v28, %v2413_v25 }
 0x6b6   : > { %v3169_v60 = vpop.eup %3168  ;;  %v2144_v30 = vadd.f32 1.0, %v3167_v46  ;;  %v3003_v0 = vpop.f32.mrb[28].mxu1  ;;  %3180 = vpow2.f32 %v2770_v40  ;;  %v2415_v40 = vld [vmem:[%s4118_s13 + $0x10] sm:$0xff]  ;;  %v2416_v46 = vld [vmem:[%s4118_s13 + $0x18] sm:$0xff] }
 0x6b7   : > { %v3171_v7 = vpop.eup %3170  ;;  %v2142_v8 = vadd.f32 1.0, %v3169_v60  ;;  %v3893_v13 = vadd.f32 %v3003_v0, %v2764_v31  ;;  %2260 = vrot.lane.b32.xlu1 %v3885_v29, %s3243_s19  ;;  %v2060_v48 = vpop.f32.mrb[29].mxu1  ;;  %3006 = vmatpush3.bf16.msra.mxu0 %v2417_v34  ;;  %v2418_v60 = vpack.c.bf16 %v2416_v46, %v2415_v40 }
 0x6b8   : > { %v3173_v52 = vpop.eup %3172  ;;  %3182 = vrcp.f32 %v2144_v30  ;;  %v2145_v15 = vadd.f32 1.0, %v3171_v7  ;;  %v3897_v53 = vadd.f32 %v2764_v31, %v2060_v48  ;;  %v3004_v36 = vpop.f32.mrb[30].mxu1  ;;  %3007 = vmatprep.subr.bf16.mxu0 %v3245_v33 }
 0x6b9   : > { %3184 = vrcp.f32 %v2142_v8  ;;  %v2775_v55 = vmul.f32 -1.442695, %v3893_v13  ;;  %v2063_v51 = vpop.f32.mrb[31].mxu1  ;;  %v2143_v61 = vadd.f32 1.0, %v3173_v52  ;;  %v3901_v50 = vadd.f32 %v3004_v36, %v2764_v31  ;;  %v2313_v30 = vpop.permute.xlu0 %2312 }
 0x6ba   : > { %v2773_v62 = vmul.f32 -1.442695, %v3897_v53  ;;  %v3903_v57 = vadd.f32 %v2764_v31, %v2063_v51  ;;  %2266 = vrot.lane.b32.xlu0 %v3897_v53, %s3243_s19  ;;  %3186 = vrcp.f32 %v2145_v15  ;;  %v2318_v7 = vpop.permute.xlu1 %2317 }
 0x6bb   : > { %3188 = vpow2.f32 %v2775_v55  ;;  %v2776_v5 = vmul.f32 -1.442695, %v3901_v50  ;;  %3008 = vmatpush3.bf16.msra.mxu0 %v2418_v60 }
 0x6bc   : > { %v2774_v27 = vmul.f32 -1.442695, %v3903_v57  ;;  %3190 = vpow2.f32 %v2773_v62  ;;  %3013 = vmatprep.subr.bf16.mxu0 %v3245_v33 }
 0x6bd   : > { %v3175_v1 = vpop.eup %3174  ;;  %3192 = vrcp.f32 %v2143_v61  ;;  %v2323_v0 = vpop.permute.xlu0 %2322 }
 0x6be   : > { %v3177_v2 = vpop.eup %3176  ;;  %v2148_v3 = vadd.f32 1.0, %v3175_v1  ;;  %3194 = vpow2.f32 %v2774_v27  ;;  %v2333_v48 = vpop.permute.xlu1 %2332 }
 0x6bf   : > { %v3179_v6 = vpop.eup %3178  ;;  %v2146_v63 = vadd.f32 1.0, %v3177_v2 }
 0x6c0   : > { %3196 = vrcp.f32 %v2148_v3  ;;  %v2149_v41 = vadd.f32 1.0, %v3179_v6  ;;  %v3181_v54 = vpop.eup %3180 }
 0x6c1   : > { %3198 = vpow2.f32 %v2776_v5  ;;  %v2147_v21 = vadd.f32 1.0, %v3181_v54  ;;  %v2328_v8 = vpop.permute.xlu0 %2327 }
 0x6c2   : > { %v3183_v16 = vpop.eup %3182  ;;  %3200 = vrcp.f32 %v2146_v63  ;;  %v3944_v15 = vpop.permute.xlu1 %2342 }
 0x6c3   : > { %v3185_v17 = vpop.eup %3184  ;;  %2194 = vrot.lane.b32.xlu1 %v3183_v16, %s3244_s30  ;;  %3202 = vrcp.f32 %v2149_v41 }
 0x6c4   : > { %2190 = vrot.lane.b32.xlu0 %v3185_v17, %s3244_s30  ;;  %v3187_v4 = vpop.eup %3186  ;;  %3204 = vrcp.f32 %v2147_v21 }
 0x6c5   : > { %v3189_v9 = vpop.eup %3188  ;;  %v2338_v52 = vpop.permute.xlu0 %2337 }
 0x6c6   : > { %v3191_v12 = vpop.eup %3190  ;;  %v2152_v26 = vadd.f32 1.0, %v3189_v9  ;;  %v3948_v55 = vpop.permute.xlu1 %2352 }
 0x6c7   : > { %2196 = vrot.lane.b32.xlu1 %v3187_v4, %s3244_s30  ;;  %v3193_v18 = vpop.eup %3192  ;;  %v2150_v31 = vadd.f32 1.0, %v3191_v12 }
 0x6c8   : > { %v3195_v24 = vpop.eup %3194  ;;  %3206 = vrcp.f32 %v2152_v26 }
 0x6c9   : > { %v2151_v58 = vadd.f32 1.0, %v3195_v24  ;;  %3208 = vrcp.f32 %v2150_v31  ;;  %v3946_v36 = vpop.permute.xlu0 %2347 }
 0x6ca   : > { %v3197_v56 = vpop.eup %3196  ;;  %v3952_v61 = vpop.permute.xlu1 %2362 }
 0x6cb   : > { %2192 = vrot.lane.b32.xlu1 %v3193_v18, %s3244_s30  ;;  %2202 = vrot.lane.b32.xlu0 %v3197_v56, %s3244_s30  ;;  %v3199_v37 = vpop.eup %3198  ;;  %3210 = vrcp.f32 %v2151_v58 }
 0x6cc   : > { %v3201_v32 = vpop.eup %3200  ;;  %v2153_v44 = vadd.f32 1.0, %v3199_v37 }
 0x6cd   : > { %v3203_v43 = vpop.eup %3202  ;;  %v3950_v51 = vpop.permute.xlu0 %2357 }
 0x6ce   : > { %v3205_v47 = vpop.eup %3204  ;;  %3212 = vrcp.f32 %v2153_v44 }
 0x6cf   : > { %2204 = vrot.lane.b32.xlu1 %v3203_v43, %s3244_s30  ;;  %2198 = vrot.lane.b32.xlu0 %v3201_v32, %s3244_s30 }
 0x6d2   : > { %v3207_v49 = vpop.eup %3206 }
 0x6d3   : > { %2200 = vrot.lane.b32.xlu1 %v3205_v47, %s3244_s30  ;;  %2210 = vrot.lane.b32.xlu0 %v3207_v49, %s3244_s30  ;;  %v3209_v59 = vpop.eup %3208 }
 0x6d5   : > { %v3211_v20 = vpop.eup %3210 }
 0x6d7   : > { %2268 = vrot.lane.b32.xlu1 %v3903_v57, %s3243_s19  ;;  %2206 = vrot.lane.b32.xlu0 %v3209_v59, %s3244_s30 }
 0x6d8   : > { %v3213_v10 = vpop.eup %3212 }
 0x6db   : > { %2208 = vrot.lane.b32.xlu1 %v3211_v20, %s3244_s30  ;;  %2367 = vperm.xlu0 %3101, %v1690_v14  }
 0x6df   : > { %2212 = vrot.lane.b32.xlu1 %v3213_v10, %s3244_s30  ;;  %2270 = vrot.lane.b32.xlu0 %v3893_v13, %s3243_s19 }
 0x6e3   : > { %2272 = vrot.lane.b32.xlu1 %v3901_v50, %s3243_s19  ;;  %s2565_s19 = scalar_lea.vmem (%p3362_p4), %s4140_s22, %s2792_s20 }
 0x71b   : > { %v2255_v62 = vpop.permute.xlu0 %2254 }
 0x71d   : > { %v2257_v27 = vpop.permute.xlu1 %2256 }
 0x71f   : > { %v2251_v1 = vpop.permute.xlu0 %2250 }
 0x721   : > { %v2253_v2 = vpop.permute.xlu1 %2252 }
 0x723   : > { %v2263_v3 = vpop.permute.xlu0 %2262 }
 0x725   : > { %v2265_v5 = vpop.permute.xlu1 %2264 }
 0x727   : > { %v2259_v6 = vpop.permute.xlu0 %2258 }
 0x729   : > { %v2261_v63 = vpop.permute.xlu1 %2260 }
 0x72c   : > { %v2267_v41 = vpop.permute.xlu0 %2266 }
 0x735   : > { %v2195_v54 = vpop.permute.xlu1 %2194 }
 0x736   : > { %v2191_v16 = vpop.permute.xlu0 %2190  ;;  %v2228_v17 = vadd.f32 %v2195_v54, %v3855_v35 }
 0x737   : > { %v2226_v21 = vadd.f32 %v2191_v16, %v3857_v38 }
 0x738   : > { %v3958_v12 = vadd.f32 %v2255_v62, %v2228_v17 }
 0x739   : > { %v2197_v4 = vpop.permute.xlu1 %2196  ;;  %v3956_v9 = vadd.f32 %v2251_v1, %v2226_v21 }
 0x73a   : > { %v2229_v26 = vadd.f32 %v2197_v4, %v3860_v42  ;;  %v2300_v37 = vmax.f32 %v3958_v12, 0.0 }
 0x73b   : > { %v2298_v31 = vmax.f32 %v3956_v9, 0.0 }
 0x73c   : > { %v3964_v58 = vadd.f32 %v2257_v27, %v2229_v26  ;;  %v2372_v47 = vmul.f32 %v2323_v0, %v2300_v37 }
 0x73d   : > { %v2203_v18 = vpop.permute.xlu0 %2202  ;;  %v2193_v24 = vpop.permute.xlu1 %2192  ;;  %v2370_v43 = vmul.f32 %v2313_v30, %v2298_v31 }
 0x73e   : > { %v2227_v56 = vadd.f32 %v2193_v24, %v3865_v45  ;;  %v2301_v45 = vmax.f32 %v3964_v58, 0.0  ;;  %v2385_v28 = vsel %vm1230_vm3, %v2372_v47, 0.0  ;;  %v2232_v46 = vadd.f32 %v2203_v18, %v3873_v11 }
 0x73f   : > { %v2382_v20 = vsel %vm1230_vm3, %v2370_v43, 0.0 }
 0x740   : > { %v3966_v35 = vadd.f32 %v2253_v2, %v2227_v56  ;;  %v2373_v40 = vmul.f32 %v2328_v8, %v2301_v45 }
 0x741   : > { %v2199_v38 = vpop.permute.xlu0 %2198  ;;  %v2205_v32 = vpop.permute.xlu1 %2204 }
 0x742   : > { %v2299_v44 = vmax.f32 %v3966_v35, 0.0  ;;  %v2230_v42 = vadd.f32 %v2199_v38, %v3877_v19  ;;  %v2387_v27 = vsel %vm1230_vm3, %v2373_v40, 0.0  ;;  %v2233_v2 = vadd.f32 %v2205_v32, %v3880_v23 }
 0x744   : > { %v2371_v49 = vmul.f32 %v2318_v7, %v2299_v44  ;;  %v3977_v59 = vadd.f32 %v2259_v6, %v2230_v42  ;;  %v4000_v17 = vadd.f32 %v2265_v5, %v2233_v2 }
 0x745   : > { %v2201_v14 = vpop.permute.xlu1 %2200  ;;  %v2211_v34 = vpop.permute.xlu0 %2210 }
 0x746   : > { %v2383_v10 = vsel %vm1230_vm3, %v2371_v49, 0.0  ;;  %v2231_v25 = vadd.f32 %v2201_v14, %v3885_v29  ;;  %v2302_v60 = vmax.f32 %v3977_v59, 0.0  ;;  %v3991_v29 = vadd.f32 %v2263_v3, %v2232_v46 }
 0x747   : > { %v2384_v19 = vadd.f32 %v2383_v10, %v2382_v20 }
 0x748   : > { %v3987_v30 = vadd.f32 %v2261_v63, %v2231_v25  ;;  %v2374_v1 = vmul.f32 %v2333_v48, %v2302_v60  ;;  %v2304_v54 = vmax.f32 %v3991_v29, 0.0 }
 0x749   : > { %v2386_v0 = vadd.f32 %v2385_v28, %v2384_v19  ;;  %v2269_v7 = vpop.permute.xlu1 %2268  ;;  %v2207_v6 = vpop.permute.xlu0 %2206 }
 0x74a   : > { %v2303_v62 = vmax.f32 %v3987_v30, 0.0  ;;  %v2389_v16 = vsel %vm1230_vm3, %v2374_v1, 0.0  ;;  %v2234_v3 = vadd.f32 %v2207_v6, %v3897_v53  ;;  %v2376_v26 = vmul.f32 %v3944_v15, %v2304_v54 }
 0x74b   : > { %v2388_v8 = vadd.f32 %v2387_v27, %v2386_v0 }
 0x74c   : > { %v2375_v63 = vmul.f32 %v2338_v52, %v2303_v62  ;;  %v2305_v52 = vmax.f32 %v4000_v17, 0.0  ;;  %v4009_v18 = vadd.f32 %v2267_v41, %v2234_v3  ;;  %v2393_v5 = vsel %vm1230_vm3, %v2376_v26, 0.0 }
 0x74d   : > { %v2209_v11 = vpop.permute.xlu1 %2208  ;;  %v2390_v21 = vadd.f32 %v2389_v16, %v2388_v8 }
 0x74e   : > { %v2391_v4 = vsel %vm1230_vm3, %v2375_v63, 0.0  ;;  %v2235_v48 = vadd.f32 %v2209_v11, %v3903_v57  ;;  %v2377_v53 = vmul.f32 %v3946_v36, %v2305_v52  ;;  %v2306_v57 = vmax.f32 %v4009_v18, 0.0 }
 0x74f   : > { %v2392_v24 = vadd.f32 %v2391_v4, %v2390_v21  ;;  %v2236_v36 = vadd.f32 %v2211_v34, %v3893_v13 }
 0x750   : > { %v4011_v56 = vadd.f32 %v2269_v7, %v2235_v48  ;;  %v2395_v41 = vsel %vm1230_vm3, %v2377_v53, 0.0  ;;  %v2378_v47 = vmul.f32 %v3948_v55, %v2306_v57  ;;  %v2419_v48 = vld [vmem:[%s4119_s14] sm:$0x1] }
 0x751   : > { %v2213_v23 = vpop.permute.xlu1 %2212  ;;  %v2394_v38 = vadd.f32 %v2393_v5, %v2392_v24 }
 0x752   : > { %v2307_v43 = vmax.f32 %v4011_v56, 0.0  ;;  %v2237_v15 = vadd.f32 %v2213_v23, %v3901_v50  ;;  %v2397_v25 = vsel %vm1230_vm3, %v2378_v47, 0.0 }
 0x753   : > { %v2396_v14 = vadd.f32 %v2395_v41, %v2394_v38 }
 0x754   : > { %v2379_v20 = vmul.f32 %v3950_v51, %v2307_v43 }
 0x755   : > { %v2273_v32 = vpop.permute.xlu1 %2272  ;;  %v2398_v19 = vadd.f32 %v2397_v25, %v2396_v14 }
 0x756   : > { %v4024_v49 = vadd.f32 %v2273_v32, %v2237_v15  ;;  %v2399_v40 = vsel %vm1230_vm3, %v2379_v20, 0.0  ;;  %v2467_v32 = vld [vmem:[%s4121_s16] sm:$0x1] }
 0x757   : > { %v2400_v13 = vadd.f32 %v2399_v40, %v2398_v19 }
 0x758   : > { %v2309_v50 = vmax.f32 %v4024_v49, 0.0 }
 0x75a   : > { %v2368_v42 = vpop.permute.xlu0 %2367 }
 0x75b   : > { %v2381_v55 = vmul.f32 %v2368_v42, %v2309_v50 }
 0x75d   : > { %v2403_v51 = vsel %vm1252_vm4, %v2381_v55, 0.0 }
 0x75e   : > { %v2271_v10 = vpop.permute.xlu0 %2270 }
 0x75f   : > { %v2296_v28 = vadd.f32 %v2271_v10, %v2236_v36 }
 0x761   : > { %v2308_v46 = vmax.f32 %v2296_v28, 0.0 }
 0x763   : > { %v2380_v0 = vmul.f32 %v3952_v61, %v2308_v46  ;;  %v2465_v61 = vld [vmem:[%s4120_s15] sm:$0x3] }
 0x764   : > { %v2466_v21 = vpack.c.bf16 %v2465_v61, %v2465_v61 }
 0x765   : > { %v2401_v34 = vsel %vm1230_vm3, %v2380_v0, 0.0 }
 0x766   : > { %v2402_v7 = vadd.f32 %v2401_v34, %v2400_v13  ;;  %v2472_v4 = vsel %vm1322_vm5, %v2466_v21, 0 }
 0x768   : > { %v2404_v27 = vadd.f32 %v2403_v51, %v2402_v7 }
 0x76a   : > { %v2405_v1 = vrot.slane %v2404_v27, 4 }
 0x76c   : > { %v2406_v2 = vadd.f32 %v2405_v1, %v2404_v27 }
 0x76e   : > { %v2407_v8 = vrot.slane %v2406_v2, 2 }
 0x770   : > { %v2408_v6 = vadd.f32 %v2407_v8, %v2406_v2 }
 0x772   : > { %v2409_v11 = vrot.slane %v2408_v6, 1 }
 0x774   : > { %v2410_v63 = vadd.f32 %v2409_v11, %v2408_v6 }
 0x776   : > { %v2411_v16 = vmul.f32 0.015625, %v2410_v63 }
 0x778   : > { %v2412_v3 = vpack.c.bf16 %v2411_v16, %v2411_v16 }
 0x77a   : > { %3010 = vmatmul.mubr.msk.bf16.vlgmr.msra.gmra.mrb[24].mxu0 %vm1230_vm3, %v2412_v3 }
 0x77b   : > { %3015 = vmatprep.mubr.msk.bf16.mxu0 %vm3246_vm2, %v3245_v33  ;;  %3014 = vmatpush3.bf16.msra.mxu0 %v2472_v4 }
 0x84d   : > { %v2457_v23 = vpop.f32.mrb[24].mxu0 }
 0x84e   : > { %v2458_v26 = vadd.f32 %v2457_v23, %v2419_v48  ;;  %v3011_v24 = vpop.f32.mrb[25].mxu0 }
 0x84f   : > { %v2460_v5 = vpop.f32.mrb[26].mxu0 }
 0x850   : > { %v2463_v53 = vmax.f32 %v2458_v26, 0.0  ;;  %v3012_v38 = vpop.f32.mrb[27].mxu0 }
 0x852   : > { %v2464_v33 = vpack.c.bf16 %v2463_v53, %v2463_v53 }
 0x854   : > { %3016 = vmatmul.mubr.msk.bf16.vlgmr.msra.gmra.mrb[28].mxu0 %vm1318_vm6, %v2464_v33 }
 0x927   : > { %v2508_v15 = vpop.f32.mrb[28].mxu0 }
 0x928   : > { %v2509_v42 = vadd.f32 %v2508_v15, %v2467_v32  ;;  %v3017_v41 = vpop.f32.mrb[29].mxu0 }
 0x929   : > { %v2511_v47 = vpop.f32.mrb[30].mxu0 }
 0x92a   : > { %v2779_v14 = vmul.f32 -1.442695, %v2509_v42  ;;  %v3018_v36 = vpop.f32.mrb[31].mxu0 }
 0x92c   : > { %3214 = vpow2.f32 %v2779_v14 }
 0x936   : > { %v3215_v20 = vpop.eup %3214 }
 0x937   : > { %v2517_v10 = vadd.f32 1.0, %v3215_v20 }
 0x939   : > { %3216 = vrcp.f32 %v2517_v10 }
 0x943   : > { %v3217_v25 = vpop.eup %3216 }
 0x944   : > { %v2523_v28 = vrot.slane %v3217_v25, %v1374_v22 }
 0x946   : > { %v2524_v19 = vmul.f32 %v2523_v28, %v2298_v31  ;;  %v2525_v40 = vmul.f32 %v2523_v28, %v2299_v44  ;;  %v2526_v55 = vmul.f32 %v2523_v28, %v2300_v37  ;;  %v2527_v0 = vmul.f32 %v2523_v28, %v2301_v45 }
 0x947   : > { %v2528_v13 = vmul.f32 %v2523_v28, %v2302_v60  ;;  %v2529_v39 = vmul.f32 %v2523_v28, %v2303_v62  ;;  %v2530_v22 = vmul.f32 %v2523_v28, %v2304_v54  ;;  %v2531_v9 = vmul.f32 %v2523_v28, %v2305_v52 }
 0x948   : > { %v2532_v31 = vmul.f32 %v2523_v28, %v2306_v57  ;;  %v2533_v12 = vmul.f32 %v2523_v28, %v2307_v43  ;;  %v2534_v37 = vmul.f32 %v2523_v28, %v2308_v46  ;;  %v2535_v58 = vmul.f32 %v2523_v28, %v2309_v50  ;;  %2536 = vst.msk [vmem:[%s537_s24] sm:$0xff] %vm1230_vm3, %v2524_v19  ;;  %2563 = sbr.rel (!%p3362_p4) target bundleno = 2391 (0x957), region = 92 }
 0x949   : > { %2780 = vst.msk [vmem:[%s537_s24 + $0x4] sm:$0xf0] %vm2538_vm11, %v2525_v40  ;;  %2783 = vst.msk [vmem:[%s537_s24 + $0x14] sm:$0xf0] %vm2538_vm11, %v2528_v13 }
 0x94a   : > { %2781 = vst.msk [vmem:[%s537_s24 + $0xc] sm:$0xf] %vm2540_vm12, %v2526_v55  ;;  %2784 = vst.msk [vmem:[%s537_s24 + $0x1c] sm:$0xf] %vm2540_vm12, %v2529_v39 }
 0x94b   : > { %2782 = vst.msk [vmem:[%s537_s24 + $0x10] sm:$0xff] %vm1230_vm3, %v2527_v0  ;;  %2785 = vst.msk [vmem:[%s537_s24 + $0x20] sm:$0xff] %vm1230_vm3, %v2530_v22 }
 0x94c   : > { %2786 = vst.msk [vmem:[%s537_s24 + $0x24] sm:$0xf0] %vm2538_vm11, %v2531_v9  ;;  %2789 = vst.msk [vmem:[%s537_s24 + $0x34] sm:$0xf0] %vm2538_vm11, %v2534_v37 }
 0x94d   : > { %2787 = vst.msk [vmem:[%s537_s24 + $0x2c] sm:$0xf] %vm2540_vm12, %v2532_v31  ;;  %2790 = vst.msk [vmem:[%s537_s24 + $0x3c] sm:$0xf] %vm2540_vm12, %v2535_v58 }
 0x94e   : > { %2788 = vst.msk [vmem:[%s537_s24 + $0x30] sm:$0xff] %vm1230_vm3, %v2533_v12 }
 0x94f   : > { %v2607_v35 = vld [vmem:[%s537_s24] sm:$0xff] }
 0x950   : > { %2608 = vst [vmem:[%s2565_s19] sm:$0xff] %v2607_v35 }
 0x951   : > { %v2609_v44 = vld [vmem:[%s537_s24 + $0x8] sm:$0xff]  ;;  %v2613_v59 = vld [vmem:[%s537_s24 + $0x18] sm:$0xff] }
 0x952   : > { %v2611_v45 = vld [vmem:[%s537_s24 + $0x10] sm:$0xff]  ;;  %v2615_v60 = vld [vmem:[%s537_s24 + $0x20] sm:$0xff]  ;;  %2610 = vst [vmem:[%s2565_s19 + $0x10] sm:$0xff] %v2609_v44  ;;  %2614 = vst [vmem:[%s2565_s19 + $0x30] sm:$0xff] %v2613_v59 }
 0x953   : > { %2612 = vst [vmem:[%s2565_s19 + $0x20] sm:$0xff] %v2611_v45  ;;  %2616 = vst [vmem:[%s2565_s19 + $0x40] sm:$0xff] %v2615_v60 }
 0x954   : > { %v2617_v30 = vld [vmem:[%s537_s24 + $0x28] sm:$0xff]  ;;  %v2621_v29 = vld [vmem:[%s537_s24 + $0x38] sm:$0xff] }
 0x955   : > { %2618 = vst [vmem:[%s2565_s19 + $0x50] sm:$0xff] %v2617_v30  ;;  %v2619_v62 = vld [vmem:[%s537_s24 + $0x30] sm:$0xff]  ;;  %2622 = vst [vmem:[%s2565_s19 + $0x70] sm:$0xff] %v2621_v29 }
 0x956   : > { %2620 = vst [vmem:[%s2565_s19 + $0x60] sm:$0xff] %v2619_v62 }
 0x957 PF: > { %s4141_s26 = sld [smem:[#allocation5_spill]]  ;;  %s4142_s24 = sld [smem:[#allocation3_spill]] }
 0x958   : > { %s4143_s25 = sld [smem:[#allocation6_spill]] }
 0x95d   : > { %p24_p8 = scmp.ge.s32.totalorder %s4141_s26, 4  }
 0x95f   :  { %26 = sbr.rel (!%p24_p8) target bundleno = 6 (0x6), region = 167 }

</bundles_post_ra>
